<compile_context>
chip_gen: v6e
topology: v6e:2x2x1
jax: 0.10.0
libtpu: 0.0.40
codegen_flags: <defaults>
</compile_context>

<pallas_src>
import functools
import math

import jax
import jax.numpy as jnp
import numpy as np
from jax import lax
from jax.experimental import pallas as pl
from jax.experimental.pallas import tpu as pltpu


# --------------------------------------------------------------------------- fused kernel
def _unet1d_fused_kernel(
    x_ref,        # (B*L, C0)            f32  concatenated gRNA+target, batch folded into rows
    w1_ref,       # (3*C0,    dim)       bf16 tap-concatenated Conv1d weights (input_proj)
    w2_ref,       # (3*dim,   2*dim)     bf16 (down1)
    w3_ref,       # (6*dim,   4*dim)     bf16 (down2)
    wu1_ref,      # (16*dim,  2*dim)     bf16 tap-concatenated ConvTranspose1d weights (up1)
    wu2_ref,      # (8*dim,   dim)       bf16 (up2)
    wout_ref,     # (dim, channels)      bf16 1x1 output projection
    vec1_ref,     # (B*L,   2*dim)       f32  [FiLM mul | folded add]  (row-expanded)
    vec2_ref,     # (B*L/2, 4*dim)       f32
    vec3_ref,     # (B*L/4, 8*dim)       f32
    bias_ref,     # (1, 3*dim+channels)  f32  [up1_b | up2_b | out_b]
    o_ref,        # (B*L, channels)      f32
    *, seq_len, dim, channels,
):
    f32, bf16 = jnp.float32, jnp.bfloat16

    def taps(x, offsets, lb):
        """(rows, C) -> (rows, K*C): lane-concat of row-shifted copies of x.

        Shifts are per batch block of length `lb` (power of two) with zero fill outside
        the block (this is the conv zero-padding AND the batch-boundary guard).  Uses
        XLU rolls + VPU masks only: no matmul on the critical path."""
        n = x.shape[0]
        rloc = jnp.bitwise_and(lax.broadcasted_iota(jnp.int32, (n, 1), 0), lb - 1)
        pieces = []
        for off in offsets:
            if off == 0:
                pieces.append(x)
            else:
                rolled = pltpu.roll(x, shift=(-off) % n, axis=0)   # rolled[i] = x[(i+off) % n]
                tgt = rloc + off
                mask = ((tgt >= 0) & (tgt < lb)).astype(x.dtype)   # zero out-of-block rows
                pieces.append(rolled * mask)
        return jnp.concatenate(pieces, axis=-1)

    def sel(n_out, pred, v):
        """Exact 0/1 row selection / scatter as a single-pass bf16 MXU matmul.

        Each output row is the sum of at most one bf16 input row (f32 accumulation),
        so the result is bit-exact on the bf16 values."""
        n_in = v.shape[0]
        r = lax.broadcasted_iota(jnp.int32, (n_out, n_in), 0)
        c = lax.broadcasted_iota(jnp.int32, (n_out, n_in), 1)
        s = pred(r, c).astype(bf16)
        return jnp.dot(s, v.astype(bf16), preferred_element_type=f32)

    def mxu(a, w_ref):
        return jnp.dot(a.astype(bf16), w_ref[...], preferred_element_type=f32)

    L = seq_len
    L2 = L // 2
    n1 = x_ref.shape[0]            # B*L
    n2, n3 = n1 // 2, n1 // 4      # B*L/2, B*L/4

    x0 = x_ref[...]                                                  # (B*L, C0)

    # ---- input_proj: Conv1d(k=3, s=1, p=1) fused with FiLM + time-emb + ReLU -----------
    x1 = jnp.maximum(
        mxu(taps(x0, (-1, 0, 1), L), w1_ref) * vec1_ref[:, :dim] + vec1_ref[:, dim:], 0.0)

    # ---- down1: Conv1d(k=3, s=2, p=1): stride-1 taps -> exact even-row pick -> matmul --
    t = sel(n2, lambda r, c: c == 2 * r, taps(x1, (-1, 0, 1), L))
    x2 = jnp.maximum(
        mxu(t, w2_ref) * vec2_ref[:, :2 * dim] + vec2_ref[:, 2 * dim:], 0.0)

    # ---- down2: Conv1d(k=3, s=2, p=1) --------------------------------------------------
    t = sel(n3, lambda r, c: c == 2 * r, taps(x2, (-1, 0, 1), L2))
    x3 = jnp.maximum(
        mxu(t, w3_ref) * vec3_ref[:, :4 * dim] + vec3_ref[:, 4 * dim:], 0.0)

    # ---- up1: ConvTranspose1d(k=4, s=2, p=1): exact zero-insertion -> taps -> matmul ----
    #      out[o] = sum_t x_up[o + 1 - t] @ W_t  with x_up[2i] = x3[i], odd rows zero.
    xu = sel(n2, lambda r, c: r == 2 * c, x3)                        # (B*L2, 4*dim)
    u1 = jnp.maximum(mxu(taps(xu, (1, 0, -1, -2), L2), wu1_ref)
                     + bias_ref[:, :2 * dim], 0.0) + x2

    # ---- up2: ConvTranspose1d(k=4, s=2, p=1) -------------------------------------------
    xu = sel(n1, lambda r, c: r == 2 * c, u1)                        # (B*L, 2*dim)
    u2 = jnp.maximum(mxu(taps(xu, (1, 0, -1, -2), L), wu2_ref)
                     + bias_ref[:, 2 * dim:3 * dim], 0.0) + x1

    # ---- output_proj: Conv1d(k=1) == pointwise matmul ----------------------------------
    o_ref[...] = (mxu(u2, wout_ref)
                  + bias_ref[:, 3 * dim:3 * dim + channels]).astype(o_ref.dtype)


# --------------------------------------------------------------------------- JAX glue
def get_timestep_embedding(timesteps, embedding_dim):
    half = embedding_dim // 2
    e = math.log(10000.0) / (half - 1)
    freqs = jnp.exp(jnp.arange(half, dtype=jnp.float32) * -e)
    emb = timesteps[:, None].astype(jnp.float32) * freqs[None, :]
    return jnp.concatenate([jnp.sin(emb), jnp.cos(emb)], axis=-1)


def _conv_w_concat(w):
    """PyTorch Conv1d weight (Cout, Cin, K) -> tap-concatenated (K*Cin, Cout) bf16."""
    cout, cin, k = w.shape
    return jnp.transpose(w, (2, 1, 0)).reshape(k * cin, cout).astype(jnp.bfloat16)


def _convT_w_concat(w):
    """PyTorch ConvTranspose1d weight (Cin, Cout, K) -> tap-concatenated (K*Cin, Cout) bf16."""
    cin, cout, k = w.shape
    return jnp.transpose(w, (2, 0, 1)).reshape(k * cin, cout).astype(jnp.bfloat16)


# --------------------------------------------------------------------------- model params
def init_params(key, dim, channels, target_dim, cond_dim, time_emb_dim):
    ks = jax.random.split(key, 26)

    def w(k, shape, scale=0.05):
        return jax.random.normal(k, shape, jnp.float32) * scale

    cin0 = channels + target_dim
    return {
        "input_proj_w": w(ks[0], (dim, cin0, 3)),
        "input_proj_b": w(ks[1], (dim,), 0.02),
        "down1_w": w(ks[2], (dim * 2, dim, 3)),
        "down1_b": w(ks[3], (dim * 2,), 0.02),
        "down2_w": w(ks[4], (dim * 4, dim * 2, 3)),
        "down2_b": w(ks[5], (dim * 4,), 0.02),
        "film1_w": w(ks[6], (dim * 2, cond_dim), 0.1),
        "film1_b": w(ks[7], (dim * 2,), 0.02),
        "film2_w": w(ks[8], (dim * 4, cond_dim), 0.1),
        "film2_b": w(ks[9], (dim * 4,), 0.02),
        "film3_w": w(ks[10], (dim * 8, cond_dim), 0.1),
        "film3_b": w(ks[11], (dim * 8,), 0.02),
        "time1_w": w(ks[12], (dim, time_emb_dim)),
        "time1_b": w(ks[13], (dim,), 0.02),
        "time2_w": w(ks[14], (dim * 2, time_emb_dim)),
        "time2_b": w(ks[15], (dim * 2,), 0.02),
        "time3_w": w(ks[16], (dim * 4, time_emb_dim)),
        "time3_b": w(ks[17], (dim * 4,), 0.02),
        "up1_w": w(ks[18], (dim * 4, dim * 2, 4)),
        "up1_b": w(ks[19], (dim * 2,), 0.02),
        "up2_w": w(ks[20], (dim * 2, dim, 4)),
        "up2_b": w(ks[21], (dim,), 0.02),
        "output_proj_w": w(ks[22], (channels, dim, 1)),
        "output_proj_b": w(ks[23], (channels,), 0.02),
    }


# --------------------------------------------------------------------------- forward
def unet1d_forward(p, gRNA, target_rna, cond, timestep, *, time_emb_dim):
    """Fully fused Pallas forward.
    Inputs: gRNA (B,L,ch), target_rna (B,L,tgt), cond (B,cd), timestep (B,)."""
    x = jnp.concatenate([gRNA, target_rna], axis=-1)        # (B, L, C0)
    B, L, C0 = x.shape
    dim = p["time1_w"].shape[0]
    ch = p["output_proj_w"].shape[0]
    # Power-of-two seq_len: block-local row masks use a bitwise AND and the
    # ConvTranspose output needs no crop (2*L//2 == L).
    assert L >= 8 and (L & (L - 1)) == 0, "fused kernel assumes power-of-two seq_len"
    # TODO(synk): general seq_len (e.g. 30) needs rem-based block masks + output cropping.
    L2, L3 = L // 2, L // 4

    # ---- tiny FiLM / time projections: left to XLA, pre-folded into (mul, add) pairs ----
    t_emb = get_timestep_embedding(timestep, time_emb_dim)   # (B, Temb)
    f1 = cond @ p["film1_w"].T + p["film1_b"]
    f2 = cond @ p["film2_w"].T + p["film2_b"]
    f3 = cond @ p["film3_w"].T + p["film3_b"]
    t1 = t_emb @ p["time1_w"].T + p["time1_b"]
    t2 = t_emb @ p["time2_w"].T + p["time2_b"]
    t3 = t_emb @ p["time3_w"].T + p["time3_b"]
    s1, sh1 = f1[:, :dim], f1[:, dim:]
    s2, sh2 = f2[:, :2 * dim], f2[:, 2 * dim:]
    s3, sh3 = f3[:, :4 * dim], f3[:, 4 * dim:]
    # relu(conv(x)*(1+s) + sh + t) == relu(conv_nobias(x)*m + a),  a = b*m + sh + t
    m1 = 1.0 + s1
    a1 = p["input_proj_b"][None, :] * m1 + sh1 + t1
    m2 = 1.0 + s2
    a2 = p["down1_b"][None, :] * m2 + sh2 + t2
    m3 = 1.0 + s3
    a3 = p["down2_b"][None, :] * m3 + sh3 + t3

    # ---- packed per-row vector operands (row-expanded to the folded-batch layout) -------
    vec1 = jnp.repeat(jnp.concatenate([m1, a1], axis=-1), L, axis=0)     # (B*L,   2*dim)
    vec2 = jnp.repeat(jnp.concatenate([m2, a2], axis=-1), L2, axis=0)    # (B*L/2, 4*dim)
    vec3 = jnp.repeat(jnp.concatenate([m3, a3], axis=-1), L3, axis=0)    # (B*L/4, 8*dim)
    bias_pack = jnp.concatenate(
        [p["up1_b"], p["up2_b"], p["output_proj_b"]])[None, :]           # (1, 3*dim+ch)

    # ---- tap-concatenated bf16 weight stacks --------------------------------------------
    w1c = _conv_w_concat(p["input_proj_w"])                  # (3*C0,   dim)
    w2c = _conv_w_concat(p["down1_w"])                       # (3*dim,  2*dim)
    w3c = _conv_w_concat(p["down2_w"])                       # (6*dim,  4*dim)
    wu1c = _convT_w_concat(p["up1_w"])                       # (16*dim, 2*dim)
    wu2c = _convT_w_concat(p["up2_w"])                       # (8*dim,  dim)
    woutc = p["output_proj_w"][:, :, 0].T.astype(jnp.bfloat16)   # (dim, ch)

    vmem = pl.BlockSpec(memory_space=pltpu.MemorySpace.VMEM)
    kern = functools.partial(_unet1d_fused_kernel, seq_len=L, dim=dim, channels=ch)
    out2d = pl.pallas_call(
        kern,
        out_shape=jax.ShapeDtypeStruct((B * L, ch), jnp.float32),
        in_specs=[vmem] * 11,
        out_specs=vmem,
    )(x.reshape(B * L, C0), w1c, w2c, w3c, wu1c, wu2c, woutc,
      vec1, vec2, vec3, bias_pack)
    return out2d.reshape(B, L, ch)


# --------------------------------------------------------------------------- pure-JAX reference
def unet1d_ref(p, gRNA, target_rna, cond, timestep, time_emb_dim):
    x = jnp.concatenate([gRNA, target_rna], axis=-1).transpose(0, 2, 1)  # NCW
    dim = p["time1_w"].shape[0]
    t_emb = get_timestep_embedding(timestep, time_emb_dim)

    lin = lambda v, w, b: v @ w.T + b
    f1 = lin(cond, p["film1_w"], p["film1_b"])
    f2 = lin(cond, p["film2_w"], p["film2_b"])
    f3 = lin(cond, p["film3_w"], p["film3_b"])
    s1, sh1 = f1[:, :dim], f1[:, dim:]
    s2, sh2 = f2[:, :2 * dim], f2[:, 2 * dim:]
    s3, sh3 = f3[:, :4 * dim], f3[:, 4 * dim:]
    t1 = lin(t_emb, p["time1_w"], p["time1_b"])[:, :, None]
    t2 = lin(t_emb, p["time2_w"], p["time2_b"])[:, :, None]
    t3 = lin(t_emb, p["time3_w"], p["time3_b"])[:, :, None]

    dn = ("NCH", "OIH", "NCH")

    def conv(v, w, b, stride, pad):
        y = lax.conv_general_dilated(v, w, (stride,), [(pad, pad)], dimension_numbers=dn)
        return y + b[None, :, None]

    def convT(v, w, b, stride, pad):
        K = w.shape[2]
        wf = jnp.transpose(w[:, :, ::-1], (1, 0, 2))
        y = lax.conv_general_dilated(
            v, wf, (1,), [(K - 1 - pad, K - 1 - pad)], lhs_dilation=(stride,),
            dimension_numbers=dn)
        return y + b[None, :, None]

    x1 = jax.nn.relu(conv(x, p["input_proj_w"], p["input_proj_b"], 1, 1) * (1 + s1[:, :, None]) + sh1[:, :, None] + t1)
    x2 = jax.nn.relu(conv(x1, p["down1_w"], p["down1_b"], 2, 1) * (1 + s2[:, :, None]) + sh2[:, :, None] + t2)
    x3 = jax.nn.relu(conv(x2, p["down2_w"], p["down2_b"], 2, 1) * (1 + s3[:, :, None]) + sh3[:, :, None] + t3)
    u1 = jax.nn.relu(convT(x3, p["up1_w"], p["up1_b"], 2, 1))[:, :, : x2.shape[2]] + x2
    u2 = jax.nn.relu(convT(u1, p["up2_w"], p["up2_b"], 2, 1))[:, :, : x1.shape[2]] + x1
    out = conv(u2, p["output_proj_w"], p["output_proj_b"], 1, 0)
    return out.transpose(0, 2, 1)


# --------------------------------------------------------------------------- main
if __name__ == "__main__":
    B, L = 2, 16
    dim, channels, target_dim, cond_dim, time_emb_dim = 32, 4, 4, 1, 16

    key = jax.random.PRNGKey(0)
    kp, kg, kt, kc, kts = jax.random.split(key, 5)
    params = init_params(kp, dim, channels, target_dim, cond_dim, time_emb_dim)

    gRNA = jax.random.normal(kg, (B, L, channels), jnp.float32)
    target_rna = jax.random.normal(kt, (B, L, target_dim), jnp.float32)
    cond = jax.random.normal(kc, (B, cond_dim), jnp.float32)
    timestep = jax.random.randint(kts, (B,), 0, 1000).astype(jnp.int32)

    fwd = jax.jit(unet1d_forward, static_argnames=("time_emb_dim",))
    out = fwd(params, gRNA, target_rna, cond, timestep, time_emb_dim=time_emb_dim)
    out = jax.block_until_ready(out)
    assert out.shape == (B, L, channels)

    ref = unet1d_ref(params, gRNA, target_rna, cond, timestep, time_emb_dim)
    # Tolerance matches bf16-operand / f32-accumulate MXU compute (per perf review);
    # the shift/selection path itself is bit-exact.
    np.testing.assert_allclose(np.asarray(out), np.asarray(ref), rtol=1e-2, atol=1e-2)

    print("KERNEL_OK")
</pallas_src>

<mosaic_0001>
module attributes {stable_mosaic.version = 11 : i64} {
  func.func @_unet1d_fused_kernel(%arg0: memref<32x8xf32, #tpu.memory_space<vmem>>, %arg1: memref<24x32xbf16, #tpu.memory_space<vmem>>, %arg2: memref<96x64xbf16, #tpu.memory_space<vmem>>, %arg3: memref<192x128xbf16, #tpu.memory_space<vmem>>, %arg4: memref<512x64xbf16, #tpu.memory_space<vmem>>, %arg5: memref<256x32xbf16, #tpu.memory_space<vmem>>, %arg6: memref<32x4xbf16, #tpu.memory_space<vmem>>, %arg7: memref<32x64xf32, #tpu.memory_space<vmem>>, %arg8: memref<16x128xf32, #tpu.memory_space<vmem>>, %arg9: memref<8x256xf32, #tpu.memory_space<vmem>>, %arg10: memref<1x100xf32, #tpu.memory_space<vmem>>, %arg11: memref<32x4xf32, #tpu.memory_space<vmem>>) attributes {dimension_semantics = [], scalar_prefetch = 0 : i64, scratch_operands = 0 : i64, tpu.core_type = #tpu.core_type<tc>} {
    %c0 = arith.constant 0 : index
    %c0_0 = arith.constant 0 : index
    %0 = vector.load %arg0[%c0, %c0_0] : memref<32x8xf32, #tpu.memory_space<vmem>>, vector<32x8xf32>
    %1 = tpu.iota {dimensions = array<i32: 0>} : vector<32x1xi32>
    %c15_i32 = arith.constant 15 : i32
    %2 = vector.broadcast %c15_i32 : i32 to vector<32x1xi32>
    %3 = arith.andi %1, %2 : vector<32x1xi32>
    %c1_i32 = arith.constant 1 : i32
    %4 = tpu.dynamic_rotate %0 by %c1_i32 dim 0 : vector<32x8xf32>, i32 -> vector<32x8xf32>
    %c-1_i32 = arith.constant -1 : i32
    %5 = vector.broadcast %c-1_i32 : i32 to vector<32x1xi32>
    %6 = arith.addi %3, %5 : vector<32x1xi32>
    %c0_i32 = arith.constant 0 : i32
    %7 = vector.broadcast %c0_i32 : i32 to vector<32x1xi32>
    %8 = arith.cmpi sge, %6, %7 : vector<32x1xi32>
    %c16_i32 = arith.constant 16 : i32
    %9 = vector.broadcast %c16_i32 : i32 to vector<32x1xi32>
    %10 = arith.cmpi slt, %6, %9 : vector<32x1xi32>
    %11 = arith.andi %8, %10 : vector<32x1xi1>
    %12 = arith.extui %11 : vector<32x1xi1> to vector<32x1xi32>
    %13 = arith.sitofp %12 : vector<32x1xi32> to vector<32x1xf32>
    %14 = vector.broadcast %13 : vector<32x1xf32> to vector<32x8xf32>
    %15 = arith.mulf %4, %14 : vector<32x8xf32>
    %c31_i32 = arith.constant 31 : i32
    %16 = tpu.dynamic_rotate %0 by %c31_i32 dim 0 : vector<32x8xf32>, i32 -> vector<32x8xf32>
    %c1_i32_1 = arith.constant 1 : i32
    %17 = vector.broadcast %c1_i32_1 : i32 to vector<32x1xi32>
    %18 = arith.addi %3, %17 : vector<32x1xi32>
    %c0_i32_2 = arith.constant 0 : i32
    %19 = vector.broadcast %c0_i32_2 : i32 to vector<32x1xi32>
    %20 = arith.cmpi sge, %18, %19 : vector<32x1xi32>
    %c16_i32_3 = arith.constant 16 : i32
    %21 = vector.broadcast %c16_i32_3 : i32 to vector<32x1xi32>
    %22 = arith.cmpi slt, %18, %21 : vector<32x1xi32>
    %23 = arith.andi %20, %22 : vector<32x1xi1>
    %24 = arith.extui %23 : vector<32x1xi1> to vector<32x1xi32>
    %25 = arith.sitofp %24 : vector<32x1xi32> to vector<32x1xf32>
    %26 = vector.broadcast %25 : vector<32x1xf32> to vector<32x8xf32>
    %27 = arith.mulf %16, %26 : vector<32x8xf32>
    %28 = tpu.concatenate %15, %0, %27 in 1 : vector<32x8xf32>, vector<32x8xf32>, vector<32x8xf32> -> vector<32x24xf32>
    %29 = arith.truncf %28 : vector<32x24xf32> to vector<32x24xbf16>
    %c0_4 = arith.constant 0 : index
    %c0_5 = arith.constant 0 : index
    %30 = vector.load %arg1[%c0_4, %c0_5] : memref<24x32xbf16, #tpu.memory_space<vmem>>, vector<24x32xbf16>
    %cst = arith.constant dense<0.000000e+00> : vector<32x32xf32>
    %31 = tpu.matmul %29, %30, %cst {dimension_numbers = #tpu.dot_dimension_numbers<[1], [0], [0], [1], [0, 0, 1, 1], [], []>} : vector<32x24xbf16>, vector<24x32xbf16>, vector<32x32xf32> -> vector<32x32xf32>
    %c0_6 = arith.constant 0 : index
    %c0_7 = arith.constant 0 : index
    %32 = vector.load %arg7[%c0_6, %c0_7] : memref<32x64xf32, #tpu.memory_space<vmem>>, vector<32x32xf32>
    %33 = arith.mulf %31, %32 : vector<32x32xf32>
    %c0_8 = arith.constant 0 : index
    %c32 = arith.constant 32 : index
    %34 = vector.load %arg7[%c0_8, %c32] : memref<32x64xf32, #tpu.memory_space<vmem>>, vector<32x32xf32>
    %35 = arith.addf %33, %34 : vector<32x32xf32>
    %cst_9 = arith.constant 0.000000e+00 : f32
    %36 = vector.broadcast %cst_9 : f32 to vector<32x32xf32>
    %37 = arith.maximumf %35, %36 : vector<32x32xf32>
    %38 = tpu.iota {dimensions = array<i32: 0>} : vector<32x1xi32>
    %c15_i32_10 = arith.constant 15 : i32
    %39 = vector.broadcast %c15_i32_10 : i32 to vector<32x1xi32>
    %40 = arith.andi %38, %39 : vector<32x1xi32>
    %c1_i32_11 = arith.constant 1 : i32
    %41 = tpu.dynamic_rotate %37 by %c1_i32_11 dim 0 : vector<32x32xf32>, i32 -> vector<32x32xf32>
    %c-1_i32_12 = arith.constant -1 : i32
    %42 = vector.broadcast %c-1_i32_12 : i32 to vector<32x1xi32>
    %43 = arith.addi %40, %42 : vector<32x1xi32>
    %c0_i32_13 = arith.constant 0 : i32
    %44 = vector.broadcast %c0_i32_13 : i32 to vector<32x1xi32>
    %45 = arith.cmpi sge, %43, %44 : vector<32x1xi32>
    %c16_i32_14 = arith.constant 16 : i32
    %46 = vector.broadcast %c16_i32_14 : i32 to vector<32x1xi32>
    %47 = arith.cmpi slt, %43, %46 : vector<32x1xi32>
    %48 = arith.andi %45, %47 : vector<32x1xi1>
    %49 = arith.extui %48 : vector<32x1xi1> to vector<32x1xi32>
    %50 = arith.sitofp %49 : vector<32x1xi32> to vector<32x1xf32>
    %51 = vector.broadcast %50 : vector<32x1xf32> to vector<32x32xf32>
    %52 = arith.mulf %41, %51 : vector<32x32xf32>
    %c31_i32_15 = arith.constant 31 : i32
    %53 = tpu.dynamic_rotate %37 by %c31_i32_15 dim 0 : vector<32x32xf32>, i32 -> vector<32x32xf32>
    %c1_i32_16 = arith.constant 1 : i32
    %54 = vector.broadcast %c1_i32_16 : i32 to vector<32x1xi32>
    %55 = arith.addi %40, %54 : vector<32x1xi32>
    %c0_i32_17 = arith.constant 0 : i32
    %56 = vector.broadcast %c0_i32_17 : i32 to vector<32x1xi32>
    %57 = arith.cmpi sge, %55, %56 : vector<32x1xi32>
    %c16_i32_18 = arith.constant 16 : i32
    %58 = vector.broadcast %c16_i32_18 : i32 to vector<32x1xi32>
    %59 = arith.cmpi slt, %55, %58 : vector<32x1xi32>
    %60 = arith.andi %57, %59 : vector<32x1xi1>
    %61 = arith.extui %60 : vector<32x1xi1> to vector<32x1xi32>
    %62 = arith.sitofp %61 : vector<32x1xi32> to vector<32x1xf32>
    %63 = vector.broadcast %62 : vector<32x1xf32> to vector<32x32xf32>
    %64 = arith.mulf %53, %63 : vector<32x32xf32>
    %65 = tpu.concatenate %52, %37, %64 in 1 : vector<32x32xf32>, vector<32x32xf32>, vector<32x32xf32> -> vector<32x96xf32>
    %66 = tpu.iota {dimensions = array<i32: 0>} : vector<16x32xi32>
    %67 = tpu.iota {dimensions = array<i32: 1>} : vector<16x32xi32>
    %c2_i32 = arith.constant 2 : i32
    %68 = vector.broadcast %c2_i32 : i32 to vector<16x32xi32>
    %69 = arith.muli %68, %66 : vector<16x32xi32>
    %70 = arith.cmpi eq, %67, %69 : vector<16x32xi32>
    %71 = arith.extui %70 : vector<16x32xi1> to vector<16x32xi32>
    %72 = arith.sitofp %71 : vector<16x32xi32> to vector<16x32xf32>
    %73 = arith.truncf %72 : vector<16x32xf32> to vector<16x32xbf16>
    %74 = arith.truncf %65 : vector<32x96xf32> to vector<32x96xbf16>
    %cst_19 = arith.constant dense<0.000000e+00> : vector<16x96xf32>
    %75 = tpu.matmul %73, %74, %cst_19 {dimension_numbers = #tpu.dot_dimension_numbers<[1], [0], [0], [1], [0, 0, 1, 1], [], []>} : vector<16x32xbf16>, vector<32x96xbf16>, vector<16x96xf32> -> vector<16x96xf32>
    %76 = arith.truncf %75 : vector<16x96xf32> to vector<16x96xbf16>
    %c0_20 = arith.constant 0 : index
    %c0_21 = arith.constant 0 : index
    %77 = vector.load %arg2[%c0_20, %c0_21] : memref<96x64xbf16, #tpu.memory_space<vmem>>, vector<96x64xbf16>
    %cst_22 = arith.constant dense<0.000000e+00> : vector<16x64xf32>
    %78 = tpu.matmul %76, %77, %cst_22 {dimension_numbers = #tpu.dot_dimension_numbers<[1], [0], [0], [1], [0, 0, 1, 1], [], []>} : vector<16x96xbf16>, vector<96x64xbf16>, vector<16x64xf32> -> vector<16x64xf32>
    %c0_23 = arith.constant 0 : index
    %c0_24 = arith.constant 0 : index
    %79 = vector.load %arg8[%c0_23, %c0_24] : memref<16x128xf32, #tpu.memory_space<vmem>>, vector<16x64xf32>
    %80 = arith.mulf %78, %79 : vector<16x64xf32>
    %c0_25 = arith.constant 0 : index
    %c64 = arith.constant 64 : index
    %81 = vector.load %arg8[%c0_25, %c64] : memref<16x128xf32, #tpu.memory_space<vmem>>, vector<16x64xf32>
    %82 = arith.addf %80, %81 : vector<16x64xf32>
    %cst_26 = arith.constant 0.000000e+00 : f32
    %83 = vector.broadcast %cst_26 : f32 to vector<16x64xf32>
    %84 = arith.maximumf %82, %83 : vector<16x64xf32>
    %85 = tpu.iota {dimensions = array<i32: 0>} : vector<16x1xi32>
    %c7_i32 = arith.constant 7 : i32
    %86 = vector.broadcast %c7_i32 : i32 to vector<16x1xi32>
    %87 = arith.andi %85, %86 : vector<16x1xi32>
    %c1_i32_27 = arith.constant 1 : i32
    %88 = tpu.dynamic_rotate %84 by %c1_i32_27 dim 0 : vector<16x64xf32>, i32 -> vector<16x64xf32>
    %c-1_i32_28 = arith.constant -1 : i32
    %89 = vector.broadcast %c-1_i32_28 : i32 to vector<16x1xi32>
    %90 = arith.addi %87, %89 : vector<16x1xi32>
    %c0_i32_29 = arith.constant 0 : i32
    %91 = vector.broadcast %c0_i32_29 : i32 to vector<16x1xi32>
    %92 = arith.cmpi sge, %90, %91 : vector<16x1xi32>
    %c8_i32 = arith.constant 8 : i32
    %93 = vector.broadcast %c8_i32 : i32 to vector<16x1xi32>
    %94 = arith.cmpi slt, %90, %93 : vector<16x1xi32>
    %95 = arith.andi %92, %94 : vector<16x1xi1>
    %96 = arith.extui %95 : vector<16x1xi1> to vector<16x1xi32>
    %97 = arith.sitofp %96 : vector<16x1xi32> to vector<16x1xf32>
    %98 = vector.broadcast %97 : vector<16x1xf32> to vector<16x64xf32>
    %99 = arith.mulf %88, %98 : vector<16x64xf32>
    %c15_i32_30 = arith.constant 15 : i32
    %100 = tpu.dynamic_rotate %84 by %c15_i32_30 dim 0 : vector<16x64xf32>, i32 -> vector<16x64xf32>
    %c1_i32_31 = arith.constant 1 : i32
    %101 = vector.broadcast %c1_i32_31 : i32 to vector<16x1xi32>
    %102 = arith.addi %87, %101 : vector<16x1xi32>
    %c0_i32_32 = arith.constant 0 : i32
    %103 = vector.broadcast %c0_i32_32 : i32 to vector<16x1xi32>
    %104 = arith.cmpi sge, %102, %103 : vector<16x1xi32>
    %c8_i32_33 = arith.constant 8 : i32
    %105 = vector.broadcast %c8_i32_33 : i32 to vector<16x1xi32>
    %106 = arith.cmpi slt, %102, %105 : vector<16x1xi32>
    %107 = arith.andi %104, %106 : vector<16x1xi1>
    %108 = arith.extui %107 : vector<16x1xi1> to vector<16x1xi32>
    %109 = arith.sitofp %108 : vector<16x1xi32> to vector<16x1xf32>
    %110 = vector.broadcast %109 : vector<16x1xf32> to vector<16x64xf32>
    %111 = arith.mulf %100, %110 : vector<16x64xf32>
    %112 = tpu.concatenate %99, %84, %111 in 1 : vector<16x64xf32>, vector<16x64xf32>, vector<16x64xf32> -> vector<16x192xf32>
    %113 = tpu.iota {dimensions = array<i32: 0>} : vector<8x16xi32>
    %114 = tpu.iota {dimensions = array<i32: 1>} : vector<8x16xi32>
    %c2_i32_34 = arith.constant 2 : i32
    %115 = vector.broadcast %c2_i32_34 : i32 to vector<8x16xi32>
    %116 = arith.muli %115, %113 : vector<8x16xi32>
    %117 = arith.cmpi eq, %114, %116 : vector<8x16xi32>
    %118 = arith.extui %117 : vector<8x16xi1> to vector<8x16xi32>
    %119 = arith.sitofp %118 : vector<8x16xi32> to vector<8x16xf32>
    %120 = arith.truncf %119 : vector<8x16xf32> to vector<8x16xbf16>
    %121 = arith.truncf %112 : vector<16x192xf32> to vector<16x192xbf16>
    %cst_35 = arith.constant dense<0.000000e+00> : vector<8x192xf32>
    %122 = tpu.matmul %120, %121, %cst_35 {dimension_numbers = #tpu.dot_dimension_numbers<[1], [0], [0], [1], [0, 0, 1, 1], [], []>} : vector<8x16xbf16>, vector<16x192xbf16>, vector<8x192xf32> -> vector<8x192xf32>
    %123 = arith.truncf %122 : vector<8x192xf32> to vector<8x192xbf16>
    %c0_36 = arith.constant 0 : index
    %c0_37 = arith.constant 0 : index
    %124 = vector.load %arg3[%c0_36, %c0_37] : memref<192x128xbf16, #tpu.memory_space<vmem>>, vector<192x128xbf16>
    %cst_38 = arith.constant dense<0.000000e+00> : vector<8x128xf32>
    %125 = tpu.matmul %123, %124, %cst_38 {dimension_numbers = #tpu.dot_dimension_numbers<[1], [0], [0], [1], [0, 0, 1, 1], [], []>} : vector<8x192xbf16>, vector<192x128xbf16>, vector<8x128xf32> -> vector<8x128xf32>
    %c0_39 = arith.constant 0 : index
    %c0_40 = arith.constant 0 : index
    %126 = vector.load %arg9[%c0_39, %c0_40] : memref<8x256xf32, #tpu.memory_space<vmem>>, vector<8x128xf32>
    %127 = arith.mulf %125, %126 : vector<8x128xf32>
    %c0_41 = arith.constant 0 : index
    %c128 = arith.constant 128 : index
    %128 = vector.load %arg9[%c0_41, %c128] : memref<8x256xf32, #tpu.memory_space<vmem>>, vector<8x128xf32>
    %129 = arith.addf %127, %128 : vector<8x128xf32>
    %cst_42 = arith.constant 0.000000e+00 : f32
    %130 = vector.broadcast %cst_42 : f32 to vector<8x128xf32>
    %131 = arith.maximumf %129, %130 : vector<8x128xf32>
    %132 = tpu.iota {dimensions = array<i32: 0>} : vector<16x8xi32>
    %133 = tpu.iota {dimensions = array<i32: 1>} : vector<16x8xi32>
    %c2_i32_43 = arith.constant 2 : i32
    %134 = vector.broadcast %c2_i32_43 : i32 to vector<16x8xi32>
    %135 = arith.muli %134, %133 : vector<16x8xi32>
    %136 = arith.cmpi eq, %132, %135 : vector<16x8xi32>
    %137 = arith.extui %136 : vector<16x8xi1> to vector<16x8xi32>
    %138 = arith.sitofp %137 : vector<16x8xi32> to vector<16x8xf32>
    %139 = arith.truncf %138 : vector<16x8xf32> to vector<16x8xbf16>
    %140 = arith.truncf %131 : vector<8x128xf32> to vector<8x128xbf16>
    %cst_44 = arith.constant dense<0.000000e+00> : vector<16x128xf32>
    %141 = tpu.matmul %139, %140, %cst_44 {dimension_numbers = #tpu.dot_dimension_numbers<[1], [0], [0], [1], [0, 0, 1, 1], [], []>} : vector<16x8xbf16>, vector<8x128xbf16>, vector<16x128xf32> -> vector<16x128xf32>
    %142 = tpu.iota {dimensions = array<i32: 0>} : vector<16x1xi32>
    %c7_i32_45 = arith.constant 7 : i32
    %143 = vector.broadcast %c7_i32_45 : i32 to vector<16x1xi32>
    %144 = arith.andi %142, %143 : vector<16x1xi32>
    %c15_i32_46 = arith.constant 15 : i32
    %145 = tpu.dynamic_rotate %141 by %c15_i32_46 dim 0 : vector<16x128xf32>, i32 -> vector<16x128xf32>
    %c1_i32_47 = arith.constant 1 : i32
    %146 = vector.broadcast %c1_i32_47 : i32 to vector<16x1xi32>
    %147 = arith.addi %144, %146 : vector<16x1xi32>
    %c0_i32_48 = arith.constant 0 : i32
    %148 = vector.broadcast %c0_i32_48 : i32 to vector<16x1xi32>
    %149 = arith.cmpi sge, %147, %148 : vector<16x1xi32>
    %c8_i32_49 = arith.constant 8 : i32
    %150 = vector.broadcast %c8_i32_49 : i32 to vector<16x1xi32>
    %151 = arith.cmpi slt, %147, %150 : vector<16x1xi32>
    %152 = arith.andi %149, %151 : vector<16x1xi1>
    %153 = arith.extui %152 : vector<16x1xi1> to vector<16x1xi32>
    %154 = arith.sitofp %153 : vector<16x1xi32> to vector<16x1xf32>
    %155 = vector.broadcast %154 : vector<16x1xf32> to vector<16x128xf32>
    %156 = arith.mulf %145, %155 : vector<16x128xf32>
    %c1_i32_50 = arith.constant 1 : i32
    %157 = tpu.dynamic_rotate %141 by %c1_i32_50 dim 0 : vector<16x128xf32>, i32 -> vector<16x128xf32>
    %c-1_i32_51 = arith.constant -1 : i32
    %158 = vector.broadcast %c-1_i32_51 : i32 to vector<16x1xi32>
    %159 = arith.addi %144, %158 : vector<16x1xi32>
    %c0_i32_52 = arith.constant 0 : i32
    %160 = vector.broadcast %c0_i32_52 : i32 to vector<16x1xi32>
    %161 = arith.cmpi sge, %159, %160 : vector<16x1xi32>
    %c8_i32_53 = arith.constant 8 : i32
    %162 = vector.broadcast %c8_i32_53 : i32 to vector<16x1xi32>
    %163 = arith.cmpi slt, %159, %162 : vector<16x1xi32>
    %164 = arith.andi %161, %163 : vector<16x1xi1>
    %165 = arith.extui %164 : vector<16x1xi1> to vector<16x1xi32>
    %166 = arith.sitofp %165 : vector<16x1xi32> to vector<16x1xf32>
    %167 = vector.broadcast %166 : vector<16x1xf32> to vector<16x128xf32>
    %168 = arith.mulf %157, %167 : vector<16x128xf32>
    %c2_i32_54 = arith.constant 2 : i32
    %169 = tpu.dynamic_rotate %141 by %c2_i32_54 dim 0 : vector<16x128xf32>, i32 -> vector<16x128xf32>
    %c-2_i32 = arith.constant -2 : i32
    %170 = vector.broadcast %c-2_i32 : i32 to vector<16x1xi32>
    %171 = arith.addi %144, %170 : vector<16x1xi32>
    %c0_i32_55 = arith.constant 0 : i32
    %172 = vector.broadcast %c0_i32_55 : i32 to vector<16x1xi32>
    %173 = arith.cmpi sge, %171, %172 : vector<16x1xi32>
    %c8_i32_56 = arith.constant 8 : i32
    %174 = vector.broadcast %c8_i32_56 : i32 to vector<16x1xi32>
    %175 = arith.cmpi slt, %171, %174 : vector<16x1xi32>
    %176 = arith.andi %173, %175 : vector<16x1xi1>
    %177 = arith.extui %176 : vector<16x1xi1> to vector<16x1xi32>
    %178 = arith.sitofp %177 : vector<16x1xi32> to vector<16x1xf32>
    %179 = vector.broadcast %178 : vector<16x1xf32> to vector<16x128xf32>
    %180 = arith.mulf %169, %179 : vector<16x128xf32>
    %181 = tpu.concatenate %156, %141, %168, %180 in 1 : vector<16x128xf32>, vector<16x128xf32>, vector<16x128xf32>, vector<16x128xf32> -> vector<16x512xf32>
    %182 = arith.truncf %181 : vector<16x512xf32> to vector<16x512xbf16>
    %c0_57 = arith.constant 0 : index
    %c0_58 = arith.constant 0 : index
    %183 = vector.load %arg4[%c0_57, %c0_58] : memref<512x64xbf16, #tpu.memory_space<vmem>>, vector<512x64xbf16>
    %cst_59 = arith.constant dense<0.000000e+00> : vector<16x64xf32>
    %184 = tpu.matmul %182, %183, %cst_59 {dimension_numbers = #tpu.dot_dimension_numbers<[1], [0], [0], [1], [0, 0, 1, 1], [], []>} : vector<16x512xbf16>, vector<512x64xbf16>, vector<16x64xf32> -> vector<16x64xf32>
    %c0_60 = arith.constant 0 : index
    %c0_61 = arith.constant 0 : index
    %185 = vector.load %arg10[%c0_60, %c0_61] : memref<1x100xf32, #tpu.memory_space<vmem>>, vector<1x64xf32>
    %186 = vector.broadcast %185 : vector<1x64xf32> to vector<16x64xf32>
    %187 = arith.addf %184, %186 : vector<16x64xf32>
    %cst_62 = arith.constant 0.000000e+00 : f32
    %188 = vector.broadcast %cst_62 : f32 to vector<16x64xf32>
    %189 = arith.maximumf %187, %188 : vector<16x64xf32>
    %190 = arith.addf %189, %84 : vector<16x64xf32>
    %191 = tpu.iota {dimensions = array<i32: 0>} : vector<32x16xi32>
    %192 = tpu.iota {dimensions = array<i32: 1>} : vector<32x16xi32>
    %c2_i32_63 = arith.constant 2 : i32
    %193 = vector.broadcast %c2_i32_63 : i32 to vector<32x16xi32>
    %194 = arith.muli %193, %192 : vector<32x16xi32>
    %195 = arith.cmpi eq, %191, %194 : vector<32x16xi32>
    %196 = arith.extui %195 : vector<32x16xi1> to vector<32x16xi32>
    %197 = arith.sitofp %196 : vector<32x16xi32> to vector<32x16xf32>
    %198 = arith.truncf %197 : vector<32x16xf32> to vector<32x16xbf16>
    %199 = arith.truncf %190 : vector<16x64xf32> to vector<16x64xbf16>
    %cst_64 = arith.constant dense<0.000000e+00> : vector<32x64xf32>
    %200 = tpu.matmul %198, %199, %cst_64 {dimension_numbers = #tpu.dot_dimension_numbers<[1], [0], [0], [1], [0, 0, 1, 1], [], []>} : vector<32x16xbf16>, vector<16x64xbf16>, vector<32x64xf32> -> vector<32x64xf32>
    %201 = tpu.iota {dimensions = array<i32: 0>} : vector<32x1xi32>
    %c15_i32_65 = arith.constant 15 : i32
    %202 = vector.broadcast %c15_i32_65 : i32 to vector<32x1xi32>
    %203 = arith.andi %201, %202 : vector<32x1xi32>
    %c31_i32_66 = arith.constant 31 : i32
    %204 = tpu.dynamic_rotate %200 by %c31_i32_66 dim 0 : vector<32x64xf32>, i32 -> vector<32x64xf32>
    %c1_i32_67 = arith.constant 1 : i32
    %205 = vector.broadcast %c1_i32_67 : i32 to vector<32x1xi32>
    %206 = arith.addi %203, %205 : vector<32x1xi32>
    %c0_i32_68 = arith.constant 0 : i32
    %207 = vector.broadcast %c0_i32_68 : i32 to vector<32x1xi32>
    %208 = arith.cmpi sge, %206, %207 : vector<32x1xi32>
    %c16_i32_69 = arith.constant 16 : i32
    %209 = vector.broadcast %c16_i32_69 : i32 to vector<32x1xi32>
    %210 = arith.cmpi slt, %206, %209 : vector<32x1xi32>
    %211 = arith.andi %208, %210 : vector<32x1xi1>
    %212 = arith.extui %211 : vector<32x1xi1> to vector<32x1xi32>
    %213 = arith.sitofp %212 : vector<32x1xi32> to vector<32x1xf32>
    %214 = vector.broadcast %213 : vector<32x1xf32> to vector<32x64xf32>
    %215 = arith.mulf %204, %214 : vector<32x64xf32>
    %c1_i32_70 = arith.constant 1 : i32
    %216 = tpu.dynamic_rotate %200 by %c1_i32_70 dim 0 : vector<32x64xf32>, i32 -> vector<32x64xf32>
    %c-1_i32_71 = arith.constant -1 : i32
    %217 = vector.broadcast %c-1_i32_71 : i32 to vector<32x1xi32>
    %218 = arith.addi %203, %217 : vector<32x1xi32>
    %c0_i32_72 = arith.constant 0 : i32
    %219 = vector.broadcast %c0_i32_72 : i32 to vector<32x1xi32>
    %220 = arith.cmpi sge, %218, %219 : vector<32x1xi32>
    %c16_i32_73 = arith.constant 16 : i32
    %221 = vector.broadcast %c16_i32_73 : i32 to vector<32x1xi32>
    %222 = arith.cmpi slt, %218, %221 : vector<32x1xi32>
    %223 = arith.andi %220, %222 : vector<32x1xi1>
    %224 = arith.extui %223 : vector<32x1xi1> to vector<32x1xi32>
    %225 = arith.sitofp %224 : vector<32x1xi32> to vector<32x1xf32>
    %226 = vector.broadcast %225 : vector<32x1xf32> to vector<32x64xf32>
    %227 = arith.mulf %216, %226 : vector<32x64xf32>
    %c2_i32_74 = arith.constant 2 : i32
    %228 = tpu.dynamic_rotate %200 by %c2_i32_74 dim 0 : vector<32x64xf32>, i32 -> vector<32x64xf32>
    %c-2_i32_75 = arith.constant -2 : i32
    %229 = vector.broadcast %c-2_i32_75 : i32 to vector<32x1xi32>
    %230 = arith.addi %203, %229 : vector<32x1xi32>
    %c0_i32_76 = arith.constant 0 : i32
    %231 = vector.broadcast %c0_i32_76 : i32 to vector<32x1xi32>
    %232 = arith.cmpi sge, %230, %231 : vector<32x1xi32>
    %c16_i32_77 = arith.constant 16 : i32
    %233 = vector.broadcast %c16_i32_77 : i32 to vector<32x1xi32>
    %234 = arith.cmpi slt, %230, %233 : vector<32x1xi32>
    %235 = arith.andi %232, %234 : vector<32x1xi1>
    %236 = arith.extui %235 : vector<32x1xi1> to vector<32x1xi32>
    %237 = arith.sitofp %236 : vector<32x1xi32> to vector<32x1xf32>
    %238 = vector.broadcast %237 : vector<32x1xf32> to vector<32x64xf32>
    %239 = arith.mulf %228, %238 : vector<32x64xf32>
    %240 = tpu.concatenate %215, %200, %227, %239 in 1 : vector<32x64xf32>, vector<32x64xf32>, vector<32x64xf32>, vector<32x64xf32> -> vector<32x256xf32>
    %241 = arith.truncf %240 : vector<32x256xf32> to vector<32x256xbf16>
    %c0_78 = arith.constant 0 : index
    %c0_79 = arith.constant 0 : index
    %242 = vector.load %arg5[%c0_78, %c0_79] : memref<256x32xbf16, #tpu.memory_space<vmem>>, vector<256x32xbf16>
    %cst_80 = arith.constant dense<0.000000e+00> : vector<32x32xf32>
    %243 = tpu.matmul %241, %242, %cst_80 {dimension_numbers = #tpu.dot_dimension_numbers<[1], [0], [0], [1], [0, 0, 1, 1], [], []>} : vector<32x256xbf16>, vector<256x32xbf16>, vector<32x32xf32> -> vector<32x32xf32>
    %c0_81 = arith.constant 0 : index
    %c64_82 = arith.constant 64 : index
    %244 = vector.load %arg10[%c0_81, %c64_82] : memref<1x100xf32, #tpu.memory_space<vmem>>, vector<1x32xf32>
    %245 = vector.broadcast %244 : vector<1x32xf32> to vector<32x32xf32>
    %246 = arith.addf %243, %245 : vector<32x32xf32>
    %cst_83 = arith.constant 0.000000e+00 : f32
    %247 = vector.broadcast %cst_83 : f32 to vector<32x32xf32>
    %248 = arith.maximumf %246, %247 : vector<32x32xf32>
    %249 = arith.addf %248, %37 : vector<32x32xf32>
    %250 = arith.truncf %249 : vector<32x32xf32> to vector<32x32xbf16>
    %c0_84 = arith.constant 0 : index
    %c0_85 = arith.constant 0 : index
    %251 = vector.load %arg6[%c0_84, %c0_85] : memref<32x4xbf16, #tpu.memory_space<vmem>>, vector<32x4xbf16>
    %cst_86 = arith.constant dense<0.000000e+00> : vector<32x4xf32>
    %252 = tpu.matmul %250, %251, %cst_86 {dimension_numbers = #tpu.dot_dimension_numbers<[1], [0], [0], [1], [0, 0, 1, 1], [], []>} : vector<32x32xbf16>, vector<32x4xbf16>, vector<32x4xf32> -> vector<32x4xf32>
    %c0_87 = arith.constant 0 : index
    %c96 = arith.constant 96 : index
    %253 = vector.load %arg10[%c0_87, %c96] : memref<1x100xf32, #tpu.memory_space<vmem>>, vector<1x4xf32>
    %254 = vector.broadcast %253 : vector<1x4xf32> to vector<32x4xf32>
    %255 = arith.addf %252, %254 : vector<32x4xf32>
    %c0_88 = arith.constant 0 : index
    %c0_89 = arith.constant 0 : index
    %256 = vector.load %arg11[%c0_88, %c0_89] : memref<32x4xf32, #tpu.memory_space<vmem>>, vector<32x4xf32>
    tpu.vector_store %arg11[%c0_88, %c0_89], %255 {strides = array<i32>} : memref<32x4xf32, #tpu.memory_space<vmem>>, vector<32x4xf32>,
    return
  }
}

</mosaic_0001>

<bundles_post_ra>
// kernel: unet1d_forward.1
= control target key start
LH: loop header
LB: loop body
LE: loop exit
PB: predicated region body
PF: predicated region fallthrough
CT: control target
= control target key end

     0   :  { %v43_v0 = vlaneseq  ;;  %v2018_v3 = vmov 0.0   ;;  %s2019_s27 = smov 8   ;;  %vm189_vm2 = vcmask 1043456   ;;  %s2020_s30 = smov 96   ;;  %vm158_vm7 = vcmask 64512   ;;  %s2666_s0 = inlined_call_operand.vmem [shape: f32[32,8], index: 0, kind: input, shape index: {}]   ;;  %s2667_s1 = inlined_call_operand.vmem [shape: bf16[24,32], index: 1, kind: input, shape index: {}]   ;;  %s2668_s7 = inlined_call_operand.vmem [shape: f32[32,64], index: 7, kind: input, shape index: {}]   ;;  %s2669_s2 = inlined_call_operand.vmem [shape: bf16[96,64], index: 2, kind: input, shape index: {}]   ;;  %s2670_s8 = inlined_call_operand.vmem [shape: f32[16,128], index: 8, kind: input, shape index: {}]   ;;  %s2671_s3 = inlined_call_operand.vmem [shape: bf16[192,128], index: 3, kind: input, shape index: {}]   ;;  %s2672_s4 = inlined_call_operand.vmem [shape: bf16[512,64], index: 4, kind: input, shape index: {}]   ;;  %s2673_s9 = inlined_call_operand.vmem [shape: f32[8,256], index: 9, kind: input, shape index: {}]   ;;  %s2674_s10 = inlined_call_operand.vmem [shape: f32[1,100], index: 10, kind: input, shape index: {}]   ;;  %s2675_s5 = inlined_call_operand.vmem [shape: bf16[256,32], index: 5, kind: input, shape index: {}]   ;;  %s2676_s6 = inlined_call_operand.vmem [shape: bf16[32,4], index: 6, kind: input, shape index: {}]   ;;  %s2677_s11 = inlined_call_operand.vmem [shape: f32[32,4], index: 11, kind: output, shape index: {}]  }
   0x1   :  { %v40_v1 = vld [vmem:[%s2666_s0 + $0x8] sm:$0xff]  ;;  %v41_v2 = vld [vmem:[%s2666_s0 + $0x10] sm:$0xff]  ;;  %1838 = vmatprep.subr.bf16.mxu0 %v2018_v3  ;;  %v39_v4 = vld [vmem:[%s2666_s0] sm:$0xff]  ;;  %s2021_s14 = smov 16   ;;  %vm163_vm8 = vcmask 130048   ;;  %vm182_vm9 = vcmask 195584  }
   0x2   :  { %v2097_v5 = vshrl.u32 %v43_v0, 7  ;;  %v54_v6 = vrot.slane %v41_v2, 7  ;;  %v53_v7 = vrot.slane %v40_v1, 7  ;;  %v90_v8 = vrot.slane %v40_v1, 1  ;;  %v42_v10 = vld [vmem:[%s2666_s0 + $0x18] sm:$0xff]  ;;  %v1949_v20 = vld [vmem:[%s2667_s1] sm:$0xff]  }
   0x3   :  { %v1883_v9 = vpack.i.bf16 %v40_v1, %v39_v4  ;;  %v52_v11 = vrot.slane %v39_v4, 7  ;;  %v91_v13 = vrot.slane %v41_v2, 1  ;;  %v1948_v14 = vld [vmem:[%s2667_s1 + $0x8] ss:$0 sps:$4 sm:$0xff]   ;;  %v55_v16 = vrot.slane %v42_v10, 7  ;;  %v242_v37 = vld [vmem:[%s2668_s7] sm:$0xff] }
   0x4   :  { %vm56_vm0 = vcmp.lt.s32.totalorder %v2097_v5, 1  ;;  %v2104_v12 = vadd.s32 8, %v2097_v5  ;;  %vm93_vm1 = vcmp.lt.s32.totalorder %v2097_v5, 7  ;;  %v1888_v18 = vpack.i.bf16 %v42_v10, %v41_v2  ;;  %1874 = vmatprep.subr.msk.bf16.mxu1 %vm189_vm2, %v1948_v14  ;;  %v244_v40 = vld [vmem:[%s2668_s7 + $0x10] sm:$0xff]  ;;  %v245_v42 = vld [vmem:[%s2668_s7 + $0x18] sm:$0xff]  ;;  %v243_v43 = vld [vmem:[%s2668_s7 + $0x8] sm:$0xff] }
   0x5   :  { %v2111_v15 = vsel %vm56_vm0, %v53_v7, %v54_v6  ;;  %1884 = vrot.lane.b32.xlu0 %v1883_v9, %s2019_s27  ;;  %v2116_v19 = vadd.s32 24, %v2097_v5  ;;  %v89_v21 = vrot.slane %v39_v4, 1  ;;  %v92_v22 = vrot.slane %v42_v10, 1  ;;  %s2022_s7 = smov 32   ;;  %s2024_s19 = smov 64  }
   0x6   :  { %v49_v17 = vand.u32 15, %v2104_v12  ;;  %v191_v23 = vsel %vm189_vm2, %v1948_v14, 0  ;;  %v57_v26 = vsel %vm56_vm0, %v54_v6, %v55_v16  ;;  %v95_v27 = vsel %vm93_vm1, %v90_v8, %v91_v13 }
   0x7   :  { %v51_v25 = vand.u32 15, %v2116_v19  ;;  %1823 = vmatpush3.bf16.msra.mxu1 %v191_v23  ;;  %v59_v28 = vsel %vm56_vm0, %v52_v11, %v53_v7  ;;  %v60_v30 = vsel %vm56_vm0, %v55_v16, %v52_v11  ;;  %v96_v31 = vsel %vm93_vm1, %v89_v21, %v90_v8 }
   0x8   :  { %v99_v24 = vadd.s32 1, %v49_v17  ;;  %1824 = vmatprep.subr.bf16.mxu1 %v1949_v20  ;;  %v97_v33 = vsel %vm93_vm1, %v92_v22, %v89_v21  ;;  %v94_v35 = vsel %vm93_vm1, %v91_v13, %v92_v22  ;;  %v2160_v44 = vadd.s32 16, %v2097_v5 }
   0x9   :  { %1889 = vrot.lane.b32.xlu0 %v1888_v18, %s2019_s27  ;;  %v101_v29 = vadd.s32 1, %v51_v25  ;;  %v48_v45 = vand.u32 15, %v2097_v5  ;;  %vm2023_vm10 = vmmov 0   ;;  %vm330_vm11 = vcmask 261120  }
   0xa   :  { %vm107_vm3 = vcmp.lt.s32.totalorder %v99_v24, 16  ;;  %v50_v46 = vand.u32 15, %v2160_v44  ;;  %1850 = vmatprep.mubr.msk.bf16.mxu0 %vm2023_vm10, %v2018_v3  ;;  %vm335_vm12 = vcmask 523264   ;;  %vm446_vm15 = vcmask 785408  }
   0xb   :  { %v2135_v32 = vsel %vm107_vm3, 1.0, %v2018_v3  ;;  %vm109_vm4 = vcmp.lt.s32.totalorder %v101_v29, 16  ;;  %1825 = vmatpush3.bf16.msra.mxu1 %v1949_v20  ;;  %v61_v47 = vadd.s32 4294967295, %v48_v45 }
   0xc   :  { %v123_v34 = vmul.f32 %v2135_v32, %v95_v27  ;;  %v2143_v36 = vsel %vm109_vm4, 1.0, %v2018_v3  ;;  %1830 = vmatprep.subr.bf16.mxu1 %v2018_v3  ;;  %v63_v48 = vadd.s32 4294967295, %v50_v46 }
   0xd   :  { %v125_v39 = vmul.f32 %v2143_v36, %v97_v33  ;;  %254 = vrot.lane.b32.xlu0 %v242_v37, %s2020_s30  ;;  %vm65_vm5 = vcmp.ge.s32.totalorder %v61_v47, 0 }
   0xe   :  { %v1893_v38 = vpack.i.bf16 %v123_v34, %v96_v31  ;;  %vm67_vm6 = vcmp.ge.s32.totalorder %v63_v48, 0  ;;  %v2169_v50 = vsel %vm65_vm5, 1.0, %v2018_v3 }
   0xf   :  { %v1898_v41 = vpack.i.bf16 %v125_v39, %v94_v35  ;;  %v2172_v53 = vsel %vm67_vm6, 1.0, %v2018_v3  ;;  %v85_v54 = vmul.f32 %v2169_v50, %v60_v30 }
  0x10   :  { %1894 = vrot.lane.b32.xlu1 %v1893_v38, %s2021_s14  ;;  %v87_v56 = vmul.f32 %v2172_v53, %v2111_v15 }
  0x11   :  { %258 = vrot.lane.b32.xlu0 %v244_v40, %s2020_s30 }
  0x14   :  { %1899 = vrot.lane.b32.xlu1 %v1898_v41, %s2021_s14 }
  0x18   :  { %260 = vrot.lane.b32.xlu1 %v245_v42, %s2020_s30 }
  0x1c   :  { %256 = vrot.lane.b32.xlu1 %v243_v43, %s2020_s30 }
  0x77   :  { %v1885_v49 = vpop.permute.xlu0 %1884 }
  0x78   :  { %v1887_v51 = vunpack.i.h.bf16 %v1885_v49  ;;  %v1886_v52 = vunpack.i.l.bf16 %v1885_v49 }
  0x7a   :  { %v159_v60 = vsel %vm158_vm7, %v85_v54, %v1886_v52  ;;  %v160_v61 = vsel %vm158_vm7, %v59_v28, %v1887_v51 }
  0x7b   :  { %v1890_v55 = vpop.permute.xlu0 %1889 }
  0x7c   :  { %v1892_v58 = vunpack.i.h.bf16 %v1890_v55  ;;  %v1891_v59 = vunpack.i.l.bf16 %v1890_v55  ;;  %v1950_v55 = vld [vmem:[%s2669_s2 + $0x28] sm:$0xff]  }
  0x7d   :  { %1839 = vmatpush3.bf16.msra.mxu0 %v1950_v55 }
  0x7e   :  { %v162_v4 = vsel %vm158_vm7, %v57_v26, %v1892_v58  ;;  %v161_v6 = vsel %vm158_vm7, %v87_v56, %v1891_v59  ;;  %v1951_v58 = vld [vmem:[%s2669_s2 + $0x20] sm:$0xff]   ;;  %1840 = vmatprep.subr.bf16.mxu0 %v2018_v3  ;;  %v1952_v59 = vld [vmem:[%s2669_s2 + $0x18] sm:$0xff]  }
  0x7f   :  { %v255_v15 = vpop.permute.xlu0 %254 }
  0x81   :  { %1841 = vmatpush3.bf16.msra.mxu0 %v1951_v58 }
  0x82   :  { %v1895_v57 = vpop.permute.xlu1 %1894  ;;  %1842 = vmatprep.subr.bf16.mxu0 %v2018_v3 }
  0x83   :  { %v1897_v62 = vunpack.i.h.bf16 %v1895_v57  ;;  %v1896_v63 = vunpack.i.l.bf16 %v1895_v57  ;;  %v259_v20 = vpop.permute.xlu0 %258 }
  0x85   :  { %v164_v1 = vsel %vm163_vm8, %v159_v60, %v1896_v63  ;;  %v165_v2 = vsel %vm163_vm8, %v160_v61, %v1897_v62  ;;  %1843 = vmatpush3.bf16.msra.mxu0 %v1952_v59  ;;  %v1953_v60 = vld [vmem:[%s2669_s2 + $0x10] sm:$0xff]   ;;  %v2290_v59 = vand.u32 7, %v2097_v5 }
  0x86   :  { %v1900_v7 = vpop.permute.xlu1 %1899  ;;  %v168_v8 = vpack.c.bf16 %v165_v2, %v164_v1  ;;  %1844 = vmatprep.subr.bf16.mxu0 %v2018_v3 }
  0x87   :  { %v1902_v9 = vunpack.i.h.bf16 %v1900_v7  ;;  %v1901_v10 = vunpack.i.l.bf16 %v1900_v7 }
  0x88   :  { %1826 = vmatprep.mubr.msk.bf16.mxu1 %vm182_vm9, %v168_v8 }
  0x89   :  { %v167_v11 = vsel %vm163_vm8, %v162_v4, %v1902_v9  ;;  %v166_v13 = vsel %vm163_vm8, %v161_v6, %v1901_v10  ;;  %1845 = vmatpush3.bf16.msra.mxu0 %v1953_v60  ;;  %v2242_v9 = vand.u32 127, %v43_v0  ;;  %v342_v10 = vmul.u32 2, %v2097_v5 }
  0x8a   :  { %v169_v14 = vpack.c.bf16 %v167_v11, %v166_v13  ;;  %v261_v18 = vpop.permute.xlu1 %260  ;;  %1846 = vmatprep.subr.bf16.mxu0 %v2018_v3  ;;  %v343_v11 = vmul.u32 2, %v2104_v12  ;;  %v2293_v60 = vand.u32 7, %v2104_v12 }
  0x8b   :  { %vm344_vm13 = vcmp.eq.s32.totalorder %v2242_v9, %v342_v10 }
  0x8c   :  { %1827 = vmatmul.mubr.msk.bf16.vlgmr.msra.gmra.mxu1 %vm182_vm9, %v169_v14  ;;  %vm345_vm14 = vcmp.eq.s32.totalorder %v2242_v9, %v343_v11 }
  0x8d   :  { %1834 = vmatprep.mubr.msk.bf16.mxu1 %vm2023_vm10, %v2018_v3 }
  0x8e   :  { %v257_v30 = vpop.permute.xlu1 %256 }
 0x14c   :  { %v1828_v16 = vpop.f32.mrf.mxu1 }
 0x14d   :  { %v248_v17 = vmul.f32 %v1828_v16, %v244_v40 }
 0x14e   :  { %v227_v21 = vpop.f32.mrf.mxu1 }
 0x14f   :  { %v246_v22 = vmul.f32 %v242_v37, %v227_v21  ;;  %v268_v24 = vadd.f32 %v259_v20, %v248_v17 }
 0x150   :  { %v1829_v23 = vpop.f32.mrf.mxu1 }
 0x151   :  { %v266_v25 = vadd.f32 %v255_v15, %v246_v22  ;;  %v249_v26 = vmul.f32 %v1829_v23, %v245_v42  ;;  %v2187_v33 = vmax.f32 %v268_v24, 0.0 }
 0x152   :  { %v230_v27 = vpop.f32.mrf.mxu1 }
 0x153   :  { %v2185_v28 = vmax.f32 %v266_v25, 0.0  ;;  %v269_v29 = vadd.f32 %v261_v18, %v249_v26  ;;  %v247_v31 = vmul.f32 %v243_v43, %v230_v27  ;;  %v288_v41 = vrot.slane %v2187_v33, 1 }
 0x154   :  { %v276_v62 = vrot.slane %v2187_v33, 7 }
 0x155   :  { %v2189_v34 = vmax.f32 %v269_v29, 0.0  ;;  %v267_v35 = vadd.f32 %v257_v30, %v247_v31  ;;  %v286_v38 = vrot.slane %v2185_v28, 1  ;;  %v274_v7 = vrot.slane %v2185_v28, 7 }
 0x157   :  { %v1903_v37 = vpack.i.bf16 %v2189_v34, %v2187_v33  ;;  %v289_v39 = vrot.slane %v2189_v34, 1  ;;  %v2195_v40 = vmax.f32 %v267_v35, 0.0  ;;  %v277_v1 = vrot.slane %v2189_v34, 7 }
 0x159   :  { %1904 = vrot.lane.b32.xlu0 %v1903_v37, %s2022_s7  ;;  %v293_v42 = vsel %vm93_vm1, %v289_v39, %v286_v38  ;;  %v287_v43 = vrot.slane %v2195_v40, 1  ;;  %v1908_v48 = vpack.i.bf16 %v2195_v40, %v2185_v28  ;;  %v290_v49 = vsel %vm93_vm1, %v288_v41, %v289_v39 }
 0x15a   :  { %v297_v47 = vmul.f32 %v2143_v36, %v293_v42  ;;  %v275_v61 = vrot.slane %v2195_v40, 7  ;;  %v278_v15 = vsel %vm56_vm0, %v276_v62, %v277_v1  ;;  %v281_v16 = vsel %vm56_vm0, %v277_v1, %v274_v7 }
 0x15b   :  { %v291_v52 = vsel %vm93_vm1, %v287_v43, %v288_v41  ;;  %v292_v56 = vsel %vm93_vm1, %v286_v38, %v287_v43  ;;  %v282_v25 = vmul.f32 %v2169_v50, %v281_v16  ;;  %v2263_v37 = vsel %vm344_vm13, 1.0, %v2018_v3 }
 0x15c   :  { %v1913_v51 = vpack.i.bf16 %v297_v47, %v290_v49  ;;  %v295_v54 = vmul.f32 %v2135_v32, %v291_v52  ;;  %v279_v2 = vsel %vm56_vm0, %v275_v61, %v276_v62  ;;  %v280_v29 = vsel %vm56_vm0, %v274_v7, %v275_v61  ;;  %v1955_v49 = vld [vmem:[%s2669_s2] sm:$0xff]   ;;  %v492_v52 = vld [vmem:[%s2670_s8 + $0x8] sm:$0xff] }
 0x15d   :  { %1909 = vrot.lane.b32.xlu0 %v1908_v48, %s2022_s7  ;;  %v284_v13 = vmul.f32 %v2172_v53, %v279_v2  ;;  %v1636_v39 = vsel %vm345_vm14, 1.0, %v2018_v3  ;;  %v1954_v48 = vld [vmem:[%s2669_s2 + $0x8] sm:$0xff]   ;;  %vm818_vm13 = vcmp.lt.s32.totalorder %v2097_v5, 2 }
 0x15e   :  { %1914 = vrot.lane.b32.xlu1 %v1913_v51, %s2024_s19  ;;  %v1918_v57 = vpack.i.bf16 %v295_v54, %v292_v56  ;;  %v350_v47 = vpack.c.bf16 %v1636_v39, %v2263_v37  ;;  %1847 = vmatpush3.bf16.msra.mxu0 %v1954_v48  ;;  %v491_v51 = vld [vmem:[%s2670_s8] sm:$0xff] }
 0x15f   :  { %1848 = vmatprep.subr.bf16.mxu0 %v2018_v3 }
 0x161   :  { %497 = vrot.lane.b32.xlu0 %v491_v51, %s2024_s19 }
 0x162   :  { %1919 = vrot.lane.b32.xlu1 %v1918_v57, %s2024_s19  ;;  %1849 = vmatpush3.bf16.msra.mxu0 %v1955_v49 }
 0x163   :  { %1854 = vmatprep.subr.bf16.mxu0 %v2018_v3 }
 0x166   :  { %499 = vrot.lane.b32.xlu1 %v492_v52, %s2024_s19 }
 0x1cb   :  { %v1905_v63 = vpop.permute.xlu0 %1904 }
 0x1cc   :  { %v1907_v4 = vunpack.i.h.bf16 %v1905_v63  ;;  %v1906_v6 = vunpack.i.l.bf16 %v1905_v63 }
 0x1ce   :  { %v333_v20 = vsel %vm330_vm11, %v284_v13, %v1906_v6  ;;  %v334_v0 = vsel %vm330_vm11, %v278_v15, %v1907_v4  ;;  %v531_v4 = vadd.s32 1, %v2290_v59  ;;  %v532_v6 = vadd.s32 1, %v2293_v60 }
 0x1cf   :  { %v1910_v8 = vpop.permute.xlu0 %1909  ;;  %v2025_v13 = vmov 0  }
 0x1d0   :  { %v1915_v14 = vpop.permute.xlu1 %1914  ;;  %v1912_v21 = vunpack.i.h.bf16 %v1910_v8  ;;  %v1911_v22 = vunpack.i.l.bf16 %v1910_v8  ;;  %vm535_vm3 = vcmp.lt.s32.totalorder %v531_v4, 8  ;;  %vm536_vm4 = vcmp.lt.s32.totalorder %v532_v6, 8  ;;  %v1965_v4 = vld [vmem:[%s2671_s3 + $0x50] sm:$0xff]   ;;  %v1966_v6 = vld [vmem:[%s2671_s3 + $0x48] sm:$0xff]  }
 0x1d1   :  { %v1917_v17 = vunpack.i.h.bf16 %v1915_v14  ;;  %v1916_v18 = vunpack.i.l.bf16 %v1915_v14 }
 0x1d2   :  { %v331_v35 = vsel %vm330_vm11, %v282_v25, %v1911_v22  ;;  %v332_v38 = vsel %vm330_vm11, %v280_v29, %v1912_v21  ;;  %v514_v29 = vadd.s32 4294967295, %v2293_v60 }
 0x1d3   :  { %v338_v23 = vsel %vm335_vm12, %v333_v20, %v1916_v18  ;;  %v339_v24 = vsel %vm335_vm12, %v334_v0, %v1917_v17  ;;  %v498_v62 = vpop.permute.xlu0 %497  ;;  %v2303_v17 = vsel %vm535_vm3, 1.0, %v2018_v3  ;;  %v2306_v18 = vsel %vm536_vm4, 1.0, %v2018_v3 }
 0x1d4   :  { %v352_v26 = vpack.c.bf16 %v339_v24, %v338_v23  ;;  %v1920_v27 = vpop.permute.xlu1 %1919  ;;  %vm516_vm6 = vcmp.ge.s32.totalorder %v514_v29, 0  ;;  %v1986_v29 = vld [vmem:[%s2672_s4 + $0xd8] sm:$0xff]  }
 0x1d5   :  { %v1922_v30 = vunpack.i.h.bf16 %v1920_v27  ;;  %v1921_v31 = vunpack.i.l.bf16 %v1920_v27  ;;  %v513_v27 = vadd.s32 4294967295, %v2290_v59 }
 0x1d6   :  { %1831 = vmatpush3.bf16.msra.mxu1 %v352_v26 }
 0x1d7   :  { %v336_v41 = vsel %vm335_vm12, %v331_v35, %v1921_v31  ;;  %v337_v42 = vsel %vm335_vm12, %v332_v38, %v1922_v30  ;;  %1832 = vmatprep.subr.bf16.mxu1 %v2018_v3  ;;  %vm515_vm5 = vcmp.ge.s32.totalorder %v513_v27, 0  ;;  %v2327_v38 = vsel %vm516_vm6, 1.0, %v2018_v3  ;;  %v1983_v27 = vld [vmem:[%s2672_s4 + $0xa0] sm:$0xff]  }
 0x1d8   :  { %v351_v43 = vpack.c.bf16 %v337_v42, %v336_v41  ;;  %v500_v8 = vpop.permute.xlu1 %499  ;;  %v2324_v35 = vsel %vm515_vm5, 1.0, %v2018_v3 }
 0x1da   :  { %1833 = vmatpush3.bf16.msra.mxu1 %v351_v43 }
 0x1dd   :  { %1835 = vmatmul.mubr.msk.bf16.vlgmr.msra.gmra.mxu1 %vm330_vm11, %v350_v47 }
 0x1de   :  { %593 = vmatprep.mubr.bf16.mxu1 %v2025_v13 }
 0x29d   :  { %v390_v54 = vpop.f32.mrf.mxu1 }
 0x29f   :  { %v1836_v55 = vpop.f32.mrf.mxu1 }
 0x2a0   :  { %v555_v55 = vpack.c.bf16 %v2263_v37, %v2263_v37  ;;  %v1958_v37 = vld [vmem:[%s2671_s3 + $0x28] sm:$0xff]  }
 0x2a1   :  { %v393_v56 = vpop.f32.mrf.mxu1 }
 0x2a2   :  { %v397_v57 = vpack.c.bf16 %v393_v56, %v390_v54  ;;  %v1956_v56 = vld [vmem:[%s2671_s3 + $0x38] sm:$0xff]  }
 0x2a3   :  { %v1837_v58 = vpop.f32.mrf.mxu1 }
 0x2a4   :  { %1851 = vmatmul.mubr.msk.bf16.vlgmr.msra.gmra.mxu0 %vm446_vm15, %v397_v57  ;;  %v1957_v57 = vld [vmem:[%s2671_s3 + $0x30] sm:$0xff]   ;;  %v1959_v58 = vld [vmem:[%s2671_s3 + $0x20] sm:$0xff]  }
 0x2a5   :  { %1856 = vmatprep.mubr.msk.bf16.mxu0 %vm2023_vm10, %v2018_v3 }
 0x364   :  { %v484_v61 = vpop.f32.mrf.mxu0 }
 0x365   :  { %v493_v63 = vmul.f32 %v491_v51, %v484_v61  ;;  %v1960_v61 = vld [vmem:[%s2671_s3 + $0x18] sm:$0xff]  }
 0x366   :  { %v1852_v1 = vpop.f32.mrf.mxu0 }
 0x367   :  { %v503_v2 = vadd.f32 %v498_v62, %v493_v63  ;;  %v1961_v62 = vld [vmem:[%s2671_s3 + $0x10] sm:$0xff]   ;;  %v1962_v63 = vld [vmem:[%s2671_s3 + $0x8] sm:$0xff]   ;;  %v1963_v1 = vld [vmem:[%s2671_s3] sm:$0xff]  }
 0x368   :  { %v487_v7 = vpop.f32.mrf.mxu0 }
 0x369   :  { %v494_v10 = vmul.f32 %v492_v52, %v487_v7  ;;  %v2298_v14 = vmax.f32 %v503_v2, 0.0  ;;  %v1964_v2 = vld [vmem:[%s2671_s3 + $0x58] sm:$0xff]   ;;  %v1967_v7 = vld [vmem:[%s2671_s3 + $0x40] sm:$0xff]  }
 0x36a   :  { %v1853_v11 = vpop.f32.mrf.mxu0 }
 0x36b   :  { %v504_v15 = vadd.f32 %v500_v8, %v494_v10  ;;  %v527_v20 = vrot.slane %v2298_v14, 1  ;;  %v509_v31 = vrot.slane %v2298_v14, 7 }
 0x36d   :  { %v2300_v16 = vmax.f32 %v504_v15, 0.0 }
 0x36f   :  { %v528_v0 = vrot.slane %v2300_v16, 1  ;;  %v1923_v21 = vpack.i.bf16 %v2300_v16, %v2298_v14  ;;  %v510_v30 = vrot.slane %v2300_v16, 7 }
 0x371   :  { %1924 = vrot.lane.b32.xlu0 %v1923_v21, %s2024_s19  ;;  %v529_v22 = vsel %vm93_vm1, %v527_v20, %v528_v0  ;;  %v530_v23 = vsel %vm93_vm1, %v528_v0, %v527_v20  ;;  %v511_v39 = vsel %vm56_vm0, %v509_v31, %v510_v30  ;;  %v512_v41 = vsel %vm56_vm0, %v510_v30, %v509_v31  ;;  %v1970_v21 = vld [vmem:[%s2672_s4 + $0xf8] sm:$0xff]   ;;  %v743_v31 = vld [vmem:[%s2673_s9] sm:$0xff] }
 0x372   :  { %v543_v24 = vmul.f32 %v2303_v17, %v529_v22  ;;  %v544_v25 = vmul.f32 %v2306_v18, %v530_v23  ;;  %v525_v48 = vmul.f32 %v2324_v35, %v512_v41  ;;  %v526_v49 = vmul.f32 %v2327_v38, %v511_v39  ;;  %v1974_v22 = vld [vmem:[%s2672_s4 + $0xf0] sm:$0xff]   ;;  %v1987_v30 = vld [vmem:[%s2672_s4 + $0x98] sm:$0xff]  }
 0x373   :  { %v1975_v23 = vld [vmem:[%s2672_s4 + $0xb0] sm:$0xff]   ;;  %v2423_v39 = vmul.u32 2, %v2242_v9 }
 0x374   :  { %v557_v26 = vpack.c.bf16 %v544_v25, %v543_v24  ;;  %v1978_v24 = vld [vmem:[%s2672_s4 + $0xe8] sm:$0xff]  }
 0x375   :  { %v1979_v25 = vld [vmem:[%s2672_s4 + $0xa8] sm:$0xff]   ;;  %vm749_vm9 = vcmp.eq.s32.totalorder %v2097_v5, %v2423_v39  ;;  %vm750_vm10 = vcmp.eq.s32.totalorder %v2104_v12, %v2423_v39  ;;  %v1969_v12 = vld [vmem:[%s2672_s4 + $0x38] sm:$0xff]   ;;  %vm1188_vm14 = vcmp.eq.s32.totalorder %v2160_v44, %v2423_v39  ;;  %vm1189_vm15 = vcmp.eq.s32.totalorder %v2116_v19, %v2423_v39 }
 0x376   :  { %575 = vmatprep.subr.bf16.mxu1 %v557_v26  ;;  %v1982_v26 = vld [vmem:[%s2672_s4 + $0xe0] sm:$0xff]   ;;  %v1663_v9 = vsel %vm749_vm9, 1.0, %v2018_v3  ;;  %v2001_v19 = vld [vmem:[%s2675_s5 + $0x38] sm:$0xff]   ;;  %v2004_v39 = vld [vmem:[%s2675_s5 + $0x68] sm:$0xff]  }
 0x3e3   :  { %v1925_v42 = vpop.permute.xlu0 %1924 }
 0x3e4   :  { %v1927_v43 = vunpack.i.h.bf16 %v1925_v42  ;;  %v1926_v47 = vunpack.i.l.bf16 %v1925_v42  ;;  %v745_v42 = vld [vmem:[%s2673_s9 + $0x8] sm:$0xff] }
 0x3e6   :  { %v553_v51 = vsel %vm335_vm12, %v525_v48, %v1926_v47  ;;  %v554_v52 = vsel %vm335_vm12, %v526_v49, %v1927_v43 }
 0x3e7   :  { %v556_v54 = vpack.c.bf16 %v554_v52, %v553_v51 }
 0x3e9   :  { %576 = vmatpush1.bf16.msra.mxu1 %v556_v54  ;;  %v1664_v54 = vsel %vm750_vm10, 1.0, %v2018_v3 }
 0x3ea   :  { %703 = vmatprep.subr.bf16.mxu1 %v2025_v13 }
 0x3ec   :  { %1649 = vmatmul.mubr.msk.bf16.vlgmr.msra.gmra.mxu1 %vm163_vm8, %v555_v55 }
 0x3ed   :  { %704 = vmatpush1.bf16.msra.mxu1 %v1956_v56  ;;  %v1968_v56 = vld [vmem:[%s2672_s4 + $0x78] sm:$0xff]  }
 0x3ee   :  { %705 = vmatprep.subr.bf16.mxu1 %v2025_v13 }
 0x3f1   :  { %706 = vmatpush1.bf16.msra.mxu1 %v1957_v57 }
 0x3f2   :  { %707 = vmatprep.subr.bf16.mxu1 %v2025_v13 }
 0x3f5   :  { %708 = vmatpush1.bf16.msra.mxu1 %v1958_v37  ;;  %v2438_v37 = vpack.c.bf16 %v1664_v54, %v1663_v9 }
 0x3f6   :  { %709 = vmatprep.subr.bf16.mxu1 %v2025_v13 }
 0x3f9   :  { %710 = vmatpush1.bf16.msra.mxu1 %v1959_v58  ;;  %v1972_v58 = vld [vmem:[%s2672_s4 + $0x70] sm:$0xff]  }
 0x3fa   :  { %711 = vmatprep.subr.bf16.mxu1 %v2025_v13 }
 0x3fd   :  { %712 = vmatpush1.bf16.msra.mxu1 %v1960_v61  ;;  %v1973_v61 = vld [vmem:[%s2672_s4 + $0x30] sm:$0xff]  }
 0x3fe   :  { %713 = vmatprep.subr.bf16.mxu1 %v2025_v13 }
 0x401   :  { %714 = vmatpush1.bf16.msra.mxu1 %v1961_v62  ;;  %v1976_v62 = vld [vmem:[%s2672_s4 + $0x68] sm:$0xff]  }
 0x402   :  { %715 = vmatprep.subr.bf16.mxu1 %v2025_v13 }
 0x405   :  { %716 = vmatpush1.bf16.msra.mxu1 %v1962_v63  ;;  %v1977_v63 = vld [vmem:[%s2672_s4 + $0x28] sm:$0xff]  }
 0x406   :  { %717 = vmatprep.subr.bf16.mxu1 %v2025_v13 }
 0x409   :  { %718 = vmatpush1.bf16.msra.mxu1 %v1963_v1  ;;  %v1980_v1 = vld [vmem:[%s2672_s4 + $0x60] sm:$0xff]  }
 0x40a   :  { %727 = vmatprep.subr.bf16.mxu1 %v2025_v13 }
 0x40d   :  { %728 = vmatpush2.bf16.msra.mxu1 %v1964_v2  ;;  %v1981_v2 = vld [vmem:[%s2672_s4 + $0x20] sm:$0xff]  }
 0x40e   :  { %729 = vmatprep.subr.bf16.mxu1 %v2025_v13 }
 0x411   :  { %730 = vmatpush2.bf16.msra.mxu1 %v1965_v4  ;;  %v1984_v4 = vld [vmem:[%s2672_s4 + $0x58] sm:$0xff]  }
 0x412   :  { %731 = vmatprep.subr.bf16.mxu1 %v2025_v13 }
 0x415   :  { %732 = vmatpush2.bf16.msra.mxu1 %v1966_v6  ;;  %v1985_v6 = vld [vmem:[%s2672_s4 + $0x18] sm:$0xff]  }
 0x416   :  { %733 = vmatprep.subr.bf16.mxu1 %v2025_v13  ;;  %v1971_v13 = vld [vmem:[%s2672_s4 + $0xb8] sm:$0xff]  }
 0x419   :  { %734 = vmatpush2.bf16.msra.mxu1 %v1967_v7  ;;  %v1988_v7 = vld [vmem:[%s2672_s4 + $0x50] sm:$0xff]  }
 0x41a   :  { %1765 = vmatprep.subr.bf16.mxu1 %v1970_v21  ;;  %v1995_v21 = vld [vmem:[%s2672_s4 + $0x88] sm:$0xff]  }
 0x4ac   :  { %v595_v8 = vpop.f32.mrf.mxu1 }
 0x4ad   :  { %v602_v15 = vpack.c.bf16 %v595_v8, %v595_v8  ;;  %v1989_v8 = vld [vmem:[%s2672_s4 + $0x10] sm:$0xff]  }
 0x4ae   :  { %v597_v10 = vpop.f32.mrf.mxu1 }
 0x4af   :  { %v603_v11 = vpack.c.bf16 %v597_v10, %v597_v10  ;;  %v1990_v10 = vld [vmem:[%s2672_s4 + $0xd0] sm:$0xff]  }
 0x4b0   :  { %v599_v20 = vpop.f32.mrf.mxu1 }
 0x4b1   :  { %1662 = vmatprep.mubr.msk.bf16.mxu1 %vm335_vm12, %v603_v11  ;;  %v1991_v11 = vld [vmem:[%s2672_s4 + $0x90] sm:$0xff]   ;;  %v1993_v20 = vld [vmem:[%s2672_s4 + $0x8] sm:$0xff]  }
 0x4b2   :  { %v600_v0 = vpop.f32.mrf.mxu1  ;;  %736 = vmatmul.mubr.bf16.vlgmr.msra.gmra.mxu1 %v602_v15  ;;  %v1992_v15 = vld [vmem:[%s2672_s4 + $0x48] sm:$0xff]  }
 0x4b3   :  { %1766 = vmatpush3.bf16.msra.mxu1 %v1971_v13  ;;  %v1994_v0 = vld [vmem:[%s2672_s4 + $0xc8] sm:$0xff]   ;;  %v1996_v13 = vld [vmem:[%s2672_s4 + $0x40] sm:$0xff]  }
 0x4b4   :  { %1767 = vmatprep.subr.bf16.mxu1 %v1974_v22  ;;  %v1997_v22 = vld [vmem:[%s2672_s4] sm:$0xff]  }
 0x4b7   :  { %1768 = vmatpush3.bf16.msra.mxu1 %v1975_v23  ;;  %v1998_v23 = vld [vmem:[%s2672_s4 + $0xc0] sm:$0xff]  }
 0x4b8   :  { %1769 = vmatprep.subr.bf16.mxu1 %v1978_v24  ;;  %v1999_v24 = vld [vmem:[%s2672_s4 + $0x80] sm:$0xff]  }
 0x4bb   :  { %1770 = vmatpush3.bf16.msra.mxu1 %v1979_v25  ;;  %v821_v25 = vadd.s32 4294967294, %v2290_v59 }
 0x4bc   :  { %1771 = vmatprep.subr.bf16.mxu1 %v1982_v26  ;;  %v822_v26 = vadd.s32 4294967294, %v2293_v60 }
 0x4bf   :  { %1772 = vmatpush3.bf16.msra.mxu1 %v1983_v27 }
 0x4c0   :  { %1773 = vmatprep.subr.bf16.mxu1 %v1986_v29 }
 0x4c3   :  { %1774 = vmatpush3.bf16.msra.mxu1 %v1987_v30 }
 0x4c4   :  { %1775 = vmatprep.subr.bf16.mxu1 %v1990_v10 }
 0x4c7   :  { %1776 = vmatpush3.bf16.msra.mxu1 %v1991_v11 }
 0x4c8   :  { %1777 = vmatprep.subr.bf16.mxu1 %v1994_v0 }
 0x4cb   :  { %1778 = vmatpush3.bf16.msra.mxu1 %v1995_v21 }
 0x4cc   :  { %1779 = vmatprep.subr.bf16.mxu1 %v1998_v23 }
 0x4cf   :  { %1780 = vmatpush3.bf16.msra.mxu1 %v1999_v24 }
 0x572   :  { %v737_v41 = vpop.f32.mrf.mxu1 }
 0x573   :  { %v744_v43 = vmul.f32 %v743_v31, %v737_v41 }
 0x574   :  { %v739_v47 = vpop.f32.mrf.mxu1 }
 0x575   :  { %v746_v48 = vadd.f32 %v745_v42, %v744_v43 }
 0x576   :  { %v740_v49 = vpop.f32.mrf.mxu1 }
 0x577   :  { %v747_v51 = vmax.f32 %v746_v48, 0.0 }
 0x578   :  { %v741_v52 = vpop.f32.mrf.mxu1 }
 0x579   :  { %v756_v55 = vpack.c.bf16 %v747_v51, %v747_v51 }
 0x57b   :  { %v761_v57 = vsel %vm189_vm2, %v756_v55, 0  ;;  %vm823_vm2 = vcmp.ge.s32.totalorder %v821_v25, 0 }
 0x57c   :  { %1855 = vmatpush3.bf16.msra.mxu0 %v761_v57  ;;  %v1666_v52 = vsel %vm823_vm2, 1.0, %v2018_v3 }
 0x57d   :  { %1743 = vmatprep.subr.bf16.mxu0 %v1968_v56 }
 0x57f   :  { %1857 = vmatmul.mubr.msk.bf16.vlgmr.msra.gmra.mxu0 %vm158_vm7, %v2438_v37  ;;  %vm824_vm7 = vcmp.ge.s32.totalorder %v822_v26, 0 }
 0x580   :  { %1744 = vmatpush3.bf16.msra.mxu0 %v1969_v12  ;;  %v1667_v59 = vsel %vm824_vm7, 1.0, %v2018_v3 }
 0x581   :  { %1745 = vmatprep.subr.bf16.mxu0 %v1972_v58 }
 0x584   :  { %1746 = vmatpush3.bf16.msra.mxu0 %v1973_v61 }
 0x585   :  { %1747 = vmatprep.subr.bf16.mxu0 %v1976_v62 }
 0x588   :  { %1748 = vmatpush3.bf16.msra.mxu0 %v1977_v63 }
 0x589   :  { %1749 = vmatprep.subr.bf16.mxu0 %v1980_v1 }
 0x58c   :  { %1750 = vmatpush3.bf16.msra.mxu0 %v1981_v2 }
 0x58d   :  { %1751 = vmatprep.subr.bf16.mxu0 %v1984_v4 }
 0x590   :  { %1752 = vmatpush3.bf16.msra.mxu0 %v1985_v6 }
 0x591   :  { %1753 = vmatprep.subr.bf16.mxu0 %v1988_v7  ;;  %v2531_v7 = vld [vmem:[%s2674_s10] ss:$0 sm:$0xff] }
 0x594   :  { %1754 = vmatpush3.bf16.msra.mxu0 %v1989_v8 }
 0x595   :  { %1755 = vmatprep.subr.bf16.mxu0 %v1992_v15 }
 0x598   :  { %1756 = vmatpush3.bf16.msra.mxu0 %v1993_v20 }
 0x599   :  { %1757 = vmatprep.subr.bf16.mxu0 %v1996_v13 }
 0x59c   :  { %1758 = vmatpush3.bf16.msra.mxu0 %v1997_v22 }
 0x63f   :  { %v797_v27 = vpop.f32.mrf.mxu0 }
 0x640   :  { %v804_v30 = vrot.slane %v797_v27, 1  ;;  %v810_v31 = vrot.slane %v797_v27, 7  ;;  %v816_v49 = vrot.slane %v797_v27, 6 }
 0x641   :  { %v1858_v29 = vpop.f32.mrf.mxu0 }
 0x643   :  { %v800_v41 = vpop.f32.mrf.mxu0 }
 0x644   :  { %v805_v42 = vrot.slane %v800_v41, 1  ;;  %v811_v43 = vrot.slane %v800_v41, 7  ;;  %v817_v47 = vrot.slane %v800_v41, 6  ;;  %v836_v48 = vpack.c.bf16 %v800_v41, %v797_v27 }
 0x645   :  { %v1859_v51 = vpop.f32.mrf.mxu0 }
 0x646   :  { %v806_v60 = vsel %vm93_vm1, %v804_v30, %v805_v42  ;;  %v807_v9 = vsel %vm93_vm1, %v805_v42, %v804_v30  ;;  %v812_v54 = vsel %vm56_vm0, %v810_v31, %v811_v43  ;;  %v813_v55 = vsel %vm56_vm0, %v811_v43, %v810_v31  ;;  %1134 = vmatprep.mubr.bf16.mxu0 %v836_v48  ;;  %v2000_v43 = vld [vmem:[%s2675_s5 + $0x78] sm:$0xff]   ;;  %v2006_v48 = vld [vmem:[%s2675_s5 + $0x60] sm:$0xff]  }
 0x647   :  { %v808_v56 = vmul.f32 %v2303_v17, %v806_v60  ;;  %v809_v57 = vmul.f32 %v2306_v18, %v807_v9  ;;  %v819_v12 = vsel %vm818_vm13, %v816_v49, %v817_v47  ;;  %v820_v58 = vsel %vm818_vm13, %v817_v47, %v816_v49  ;;  %v2005_v47 = vld [vmem:[%s2675_s5 + $0x28] sm:$0xff]   ;;  %v2007_v49 = vld [vmem:[%s2675_s5 + $0x20] sm:$0xff]   ;;  %v2008_v51 = vld [vmem:[%s2675_s5 + $0x58] sm:$0xff]  }
 0x648   :  { %v833_v61 = vmul.f32 %v1666_v52, %v820_v58  ;;  %v834_v62 = vmul.f32 %v1667_v59, %v819_v12  ;;  %v814_v63 = vmul.f32 %v2324_v35, %v813_v55  ;;  %v815_v1 = vmul.f32 %v2327_v38, %v812_v54  ;;  %v2009_v52 = vld [vmem:[%s2675_s5 + $0x18] sm:$0xff]   ;;  %v2010_v59 = vld [vmem:[%s2675_s5 + $0x50] sm:$0xff]   ;;  %v2012_v9 = vld [vmem:[%s2675_s5 + $0x48] sm:$0xff]  }
 0x649   :  { %v835_v2 = vpack.c.bf16 %v809_v57, %v808_v56  ;;  %v1701_v30 = vsel %vm1188_vm14, 1.0, %v2018_v3  ;;  %v1702_v31 = vsel %vm1189_vm15, 1.0, %v2018_v3  ;;  %v2011_v60 = vld [vmem:[%s2675_s5 + $0x10] sm:$0xff]   ;;  %v2013_v54 = vld [vmem:[%s2675_s5 + $0x8] sm:$0xff]   ;;  %v1282_v55 = vadd.s32 4294967294, %v48_v45  ;;  %v2014_v12 = vld [vmem:[%s2675_s5 + $0x40] sm:$0xff]  }
 0x64a   :  { %v838_v4 = vpack.c.bf16 %v834_v62, %v833_v61  ;;  %v837_v6 = vpack.c.bf16 %v815_v1, %v814_v63  ;;  %v1194_v42 = vpack.c.bf16 %v1702_v31, %v1701_v30  ;;  %v1284_v57 = vadd.s32 4294967294, %v50_v46  ;;  %v2015_v58 = vld [vmem:[%s2675_s5] sm:$0xff]  }
 0x64b   :  { %1135 = vmatmul.mubr.bf16.vlgmr.msra.gmra.mxu0 %v835_v2 }
 0x64c   :  { %1175 = vmatprep.mubr.bf16.mxu1 %v838_v4  ;;  %1862 = vmatprep.mubr.msk.bf16.mxu0 %vm163_vm8, %v2438_v37  ;;  %vm1288_vm3 = vcmp.ge.s32.totalorder %v1284_v57, 0 }
 0x64d   :  { %1176 = vmatmul.mubr.bf16.vlgmr.msra.gmra.mxu1 %v837_v6 }
 0x70b   :  { %v1759_v17 = vpop.f32.mrf.mxu0 }
 0x70d   :  { %v1781_v18 = vpop.f32.mrf.mxu1  ;;  %v1760_v8 = vpop.f32.mrf.mxu0 }
 0x70e   :  { %v1761_v35 = vadd.f32 %v1760_v8, %v1759_v17  ;;  %v1706_v8 = vsel %vm1288_vm3, 1.0, %v2018_v3 }
 0x70f   :  { %v1782_v10 = vpop.f32.mrf.mxu1  ;;  %v1762_v38 = vpop.f32.mrf.mxu0 }
 0x710   :  { %v1137_v11 = vadd.f32 %v1761_v35, %v2531_v7  ;;  %v1783_v15 = vadd.f32 %v1782_v10, %v1781_v18 }
 0x711   :  { %v1784_v20 = vpop.f32.mrf.mxu1  ;;  %v1763_v0 = vpop.f32.mrf.mxu0 }
 0x712   :  { %v1178_v21 = vadd.f32 %v1783_v15, %v1137_v11  ;;  %v1764_v13 = vadd.f32 %v1763_v0, %v1762_v38 }
 0x713   :  { %v1785_v37 = vpop.f32.mrf.mxu1 }
 0x714   :  { %v1140_v22 = vadd.f32 %v1764_v13, %v2531_v7  ;;  %v1786_v23 = vadd.f32 %v1785_v37, %v1784_v20  ;;  %v1184_v24 = vmax.f32 %v1178_v21, 0.0 }
 0x716   :  { %v1181_v25 = vadd.f32 %v1786_v23, %v1140_v22  ;;  %v1186_v27 = vadd.f32 %v1184_v24, %v2298_v14  ;;  %v2002_v14 = vld [vmem:[%s2675_s5 + $0x70] sm:$0xff]  }
 0x718   :  { %v1185_v26 = vmax.f32 %v1181_v25, 0.0 }
 0x71a   :  { %v1187_v29 = vadd.f32 %v1185_v26, %v2300_v16  ;;  %v2003_v16 = vld [vmem:[%s2675_s5 + $0x30] sm:$0xff]  }
 0x71c   :  { %v1195_v41 = vpack.c.bf16 %v1187_v29, %v1186_v27 }
 0x71e   :  { %1860 = vmatprep.subr.bf16.mxu0 %v1195_v41 }
 0x71f   :  { %1861 = vmatpush3.bf16.msra.mxu0 %v1195_v41 }
 0x720   :  { %1790 = vmatprep.subr.bf16.mxu0 %v2000_v43 }
 0x722   :  { %1863 = vmatmul.mubr.msk.bf16.vlgmr.msra.gmra.mxu0 %vm163_vm8, %v1194_v42  ;;  %vm1286_vm8 = vcmp.ge.s32.totalorder %v1282_v55, 0 }
 0x723   :  { %1791 = vmatpush3.bf16.msra.mxu0 %v2001_v19  ;;  %v1705_v6 = vsel %vm1286_vm8, 1.0, %v2018_v3 }
 0x724   :  { %1792 = vmatprep.subr.bf16.mxu0 %v2002_v14 }
 0x727   :  { %1793 = vmatpush3.bf16.msra.mxu0 %v2003_v16 }
 0x728   :  { %1794 = vmatprep.subr.bf16.mxu0 %v2004_v39 }
 0x72b   :  { %1795 = vmatpush3.bf16.msra.mxu0 %v2005_v47 }
 0x72c   :  { %1796 = vmatprep.subr.bf16.mxu0 %v2006_v48 }
 0x72f   :  { %1797 = vmatpush3.bf16.msra.mxu0 %v2007_v49 }
 0x730   :  { %1798 = vmatprep.subr.bf16.mxu0 %v2008_v51 }
 0x733   :  { %1799 = vmatpush3.bf16.msra.mxu0 %v2009_v52 }
 0x734   :  { %1800 = vmatprep.subr.bf16.mxu0 %v2010_v59 }
 0x737   :  { %1801 = vmatpush3.bf16.msra.mxu0 %v2011_v60 }
 0x738   :  { %1802 = vmatprep.subr.bf16.mxu0 %v2012_v9 }
 0x73b   :  { %1803 = vmatpush3.bf16.msra.mxu0 %v2013_v54 }
 0x73c   :  { %1804 = vmatprep.subr.bf16.mxu0 %v2014_v12 }
 0x73f   :  { %1805 = vmatpush3.bf16.msra.mxu0 %v2015_v58 }
 0x7e2   :  { %v1864_v56 = vpop.f32.mrf.mxu0 }
 0x7e3   :  { %v1276_v35 = vrot.slane %v1864_v56, 6  ;;  %v1264_v15 = vrot.slane %v1864_v56, 7  ;;  %v1252_v0 = vrot.slane %v1864_v56, 1 }
 0x7e4   :  { %v1235_v61 = vpop.f32.mrf.mxu0 }
 0x7e5   :  { %v1250_v62 = vrot.slane %v1235_v61, 1  ;;  %v1262_v45 = vrot.slane %v1235_v61, 7  ;;  %v1274_v2 = vrot.slane %v1235_v61, 6 }
 0x7e6   :  { %v1865_v63 = vpop.f32.mrf.mxu0 }
 0x7e7   :  { %v1253_v1 = vrot.slane %v1865_v63, 1  ;;  %v1265_v44 = vrot.slane %v1865_v63, 7  ;;  %v1277_v46 = vrot.slane %v1865_v63, 6  ;;  %v1943_v23 = vpack.i.bf16 %v1865_v63, %v1864_v56 }
 0x7e8   :  { %v1238_v4 = vpop.f32.mrf.mxu0 }
 0x7e9   :  { %v1257_v17 = vsel %vm93_vm1, %v1253_v1, %v1250_v62  ;;  %v1269_v18 = vsel %vm56_vm0, %v1265_v44, %v1262_v45  ;;  %v1275_v10 = vrot.slane %v1238_v4, 6  ;;  %v1933_v38 = vpack.i.bf16 %v1238_v4, %v1235_v61 }
 0x7ea   :  { %v1281_v11 = vsel %vm818_vm13, %v1277_v46, %v1274_v2  ;;  %v1266_v3 = vsel %vm56_vm0, %v1264_v15, %v1265_v44  ;;  %v1254_v24 = vsel %vm93_vm1, %v1252_v0, %v1253_v1  ;;  %v1278_v25 = vsel %vm818_vm13, %v1276_v35, %v1277_v46  ;;  %v2016_v1 = vld [vmem:[%s2676_s6 + $0x8] sm:$0xff]  }
 0x7eb   :  { %v1306_v20 = vmul.f32 %v1705_v6, %v1281_v11  ;;  %1934 = vrot.lane.b32.xlu0 %v1933_v38, %s2024_s19  ;;  %v1280_v21 = vsel %vm818_vm13, %v1274_v2, %v1275_v10  ;;  %v1279_v13 = vsel %vm818_vm13, %v1275_v10, %v1276_v35  ;;  %v1251_v27 = vrot.slane %v1238_v4, 1  ;;  %1866 = vmatprep.subr.bf16.mxu1 %v2016_v1 }
 0x7ec   :  { %v1308_v22 = vmul.f32 %v1706_v8, %v1279_v13  ;;  %v1263_v30 = vrot.slane %v1238_v4, 7  ;;  %v1270_v52 = vmul.f32 %v2169_v50, %v1269_v18  ;;  %v1261_v9 = vmul.f32 %v2143_v36, %v1257_v17  ;;  %1867 = vmatpush3.bf16.msra.mxu1 %v2016_v1 }
 0x7ed   :  { %v1928_v37 = vpack.i.bf16 %v1280_v21, %v1306_v20  ;;  %v1255_v29 = vsel %vm93_vm1, %v1251_v27, %v1252_v0  ;;  %v1256_v19 = vsel %vm93_vm1, %v1250_v62, %v1251_v27 }
 0x7ee   :  { %v1938_v26 = vpack.i.bf16 %v1278_v25, %v1308_v22  ;;  %v1259_v43 = vmul.f32 %v2135_v32, %v1255_v29  ;;  %v1267_v14 = vsel %vm56_vm0, %v1263_v30, %v1264_v15  ;;  %v1268_v32 = vsel %vm56_vm0, %v1262_v45, %v1263_v30 }
 0x7ef   :  { %1929 = vrot.lane.b32.xlu1 %v1928_v37, %s2024_s19  ;;  %1944 = vrot.lane.b32.xlu0 %v1943_v23, %s2024_s19  ;;  %v1272_v50 = vmul.f32 %v2172_v53, %v1267_v14  ;;  %v2017_v53 = vld [vmem:[%s2676_s6] sm:$0xff]   ;;  %vm1618_vm0 = vcmask 31744  }
 0x7f0   :  { %1868 = vmatprep.subr.bf16.mxu1 %v2017_v53 }
 0x7f1   :  { %1869 = vmatpush3.bf16.msra.mxu1 %v2017_v53 }
 0x7f3   :  { %1939 = vrot.lane.b32.xlu1 %v1938_v26, %s2024_s19  ;;  %1560 = vrot.lane.b32.xlu0 %v2531_v7, %s2022_s7 }
 0x7f7   :  { %1482 = vrot.lane.b32.xlu1 %v2531_v7, %s2024_s19 }
 0x85d   :  { %v1935_v31 = vpop.permute.xlu0 %1934 }
 0x85e   :  { %v1937_v41 = vunpack.i.h.bf16 %v1935_v31  ;;  %v1936_v42 = vunpack.i.l.bf16 %v1935_v31 }
 0x860   :  { %v1342_v16 = vsel %vm335_vm12, %v1256_v19, %v1936_v42  ;;  %v1343_v7 = vsel %vm335_vm12, %v1259_v43, %v1937_v41 }
 0x861   :  { %v1930_v39 = vpop.permute.xlu1 %1929  ;;  %v1350_v47 = vpack.c.bf16 %v1343_v7, %v1342_v16  ;;  %v1945_v51 = vpop.permute.xlu0 %1944 }
 0x862   :  { %v1932_v48 = vunpack.i.h.bf16 %v1930_v39  ;;  %v1931_v49 = vunpack.i.l.bf16 %v1930_v39  ;;  %v1947_v59 = vunpack.i.h.bf16 %v1945_v51  ;;  %v1946_v60 = vunpack.i.l.bf16 %v1945_v51 }
 0x864   :  { %v1346_v54 = vsel %vm335_vm12, %v1270_v52, %v1931_v49  ;;  %v1347_v55 = vsel %vm335_vm12, %v1268_v32, %v1932_v48  ;;  %v1344_v12 = vsel %vm335_vm12, %v1254_v24, %v1946_v60  ;;  %v1345_v58 = vsel %vm335_vm12, %v1261_v9, %v1947_v59 }
 0x865   :  { %v1940_v56 = vpop.permute.xlu1 %1939  ;;  %v1351_v57 = vpack.c.bf16 %v1347_v55, %v1346_v54  ;;  %v1352_v63 = vpack.c.bf16 %v1345_v58, %v1344_v12  ;;  %v1561_v31 = vpop.permute.xlu0 %1560 }
 0x866   :  { %v1942_v61 = vunpack.i.h.bf16 %v1940_v56  ;;  %v1941_v62 = vunpack.i.l.bf16 %v1940_v56 }
 0x867   :  { %1517 = vmatprep.mubr.bf16.mxu0 %v1351_v57 }
 0x868   :  { %1518 = vmatmul.mubr.bf16.vlgmr.msra.gmra.mxu0 %v1350_v47  ;;  %v1348_v5 = vsel %vm335_vm12, %v1272_v50, %v1941_v62  ;;  %v1349_v36 = vsel %vm335_vm12, %v1266_v3, %v1942_v61 }
 0x869   :  { %v1353_v45 = vpack.c.bf16 %v1349_v36, %v1348_v5  ;;  %v1483_v2 = vpop.permute.xlu1 %1482 }
 0x86b   :  { %1525 = vmatprep.mubr.bf16.mxu0 %v1353_v45 }
 0x870   :  { %1526 = vmatmul.mubr.bf16.gmra.mxu0 %v1352_v63 }
 0x928   :  { %v1806_v44 = vpop.f32.mrf.mxu0 }
 0x92a   :  { %v1807_v46 = vpop.f32.mrf.mxu0 }
 0x92b   :  { %v1808_v4 = vadd.f32 %v1807_v46, %v1806_v44 }
 0x92c   :  { %v1809_v6 = vpop.f32.mrf.mxu0 }
 0x92d   :  { %v1520_v17 = vadd.f32 %v1808_v4, %v1483_v2 }
 0x92e   :  { %v1810_v18 = vpop.f32.mrf.mxu0 }
 0x92f   :  { %v1811_v8 = vadd.f32 %v1810_v18, %v1809_v6  ;;  %v1534_v10 = vmax.f32 %v1520_v17, 0.0 }
 0x930   :  { %v1812_v35 = vpop.f32.mrf.mxu0 }
 0x931   :  { %v1523_v38 = vadd.f32 %v1811_v8, %v1483_v2  ;;  %v1538_v21 = vadd.f32 %v1534_v10, %v2185_v28 }
 0x932   :  { %v1813_v11 = vpop.f32.mrf.mxu0 }
 0x933   :  { %v1535_v15 = vmax.f32 %v1523_v38, 0.0  ;;  %v1814_v20 = vadd.f32 %v1813_v11, %v1812_v35 }
 0x934   :  { %v1815_v0 = vpop.f32.mrf.mxu0 }
 0x935   :  { %v1539_v13 = vadd.f32 %v1535_v15, %v2195_v40  ;;  %v1528_v37 = vadd.f32 %v1814_v20, %v1483_v2 }
 0x936   :  { %v1816_v22 = vpop.f32.mrf.mxu0 }
 0x937   :  { %v1542_v3 = vpack.c.bf16 %v1539_v13, %v1538_v21  ;;  %v1817_v23 = vadd.f32 %v1816_v22, %v1815_v0  ;;  %v1536_v24 = vmax.f32 %v1528_v37, 0.0 }
 0x939   :  { %v1531_v25 = vadd.f32 %v1817_v23, %v1483_v2  ;;  %1870 = vmatprep.mubr.msk.bf16.mxu1 %vm330_vm11, %v1542_v3  ;;  %v1540_v27 = vadd.f32 %v1536_v24, %v2187_v33 }
 0x93b   :  { %v1537_v26 = vmax.f32 %v1531_v25, 0.0 }
 0x93d   :  { %v1541_v29 = vadd.f32 %v1537_v26, %v2189_v34 }
 0x93f   :  { %v1543_v30 = vpack.c.bf16 %v1541_v29, %v1540_v27 }
 0x941   :  { %1871 = vmatmul.mubr.msk.bf16.vlgmr.msra.gmra.mxu1 %vm330_vm11, %v1543_v30 }
 0xa01   :  { %v1872_v28 = vpop.f32.mrf.mxu1 }
 0xa02   :  { %v1612_v40 = vadd.f32 %v1872_v28, %v1561_v31 }
 0xa03   :  { %v1603_v41 = vpop.f32.mrf.mxu1 }
 0xa04   :  { %1621 = vst.msk [vmem:[%s2677_s11 + $0x10] sm:$0xff] %vm1618_vm0, %v1612_v40  ;;  %v1604_v42 = vadd.f32 %v1603_v41, %v1561_v31 }
 0xa05   :  { %v1873_v43 = vpop.f32.mrf.mxu1 }
 0xa06   :  { %1619 = vst.msk [vmem:[%s2677_s11] sm:$0xff] %vm1618_vm0, %v1604_v42  ;;  %v1615_v33 = vadd.f32 %v1873_v43, %v1561_v31 }
 0xa07   :  { %v1606_v34 = vpop.f32.mrf.mxu1 }
 0xa08   :  { %1622 = vst.msk [vmem:[%s2677_s11 + $0x18] sm:$0xff] %vm1618_vm0, %v1615_v33  ;;  %v1607_v19 = vadd.f32 %v1606_v34, %v1561_v31 }
 0xa0a   :  { %1620 = vst.msk [vmem:[%s2677_s11 + $0x8] sm:$0xff] %vm1618_vm0, %v1607_v19 }

</bundles_post_ra>
